<compile_context>
chip_gen: v5e
topology: v5e:2x2
jax: 0.10.0
libtpu: 0.0.40
codegen_flags: <defaults>
</compile_context>

<pallas_src>
import functools

import jax
import jax.numpy as jnp
from jax.experimental import pallas as pl
from jax.experimental.pallas import tpu as pltpu

LANE = 128


def _round_up(x, m):
    return (x + m - 1) // m * m


def _pick_row_tile(n):
    for t in (256, 128, 64, 32, 16, 8):
        if n % t == 0:
            return t
    return n


def _gat_layer_kernel(x_ref, w_ref, a_ref, adj_ref, bias_ref, out_ref,
                      xh_ref, acol_ref, *, heads, fout, fout_pad,
                      negative_slope):
    """One grid step = one tile of query rows; all heads handled in-body."""
    i = pl.program_id(0)
    tm = adj_ref.shape[0]

    # Grid step 0: transform ALL nodes once (values + folded attention logits)
    # and keep them resident in VMEM scratch for every row tile.
    @pl.when(i == 0)
    def _():
        xb = x_ref[...].astype(jnp.bfloat16)
        xh = jnp.dot(xb, w_ref[...], preferred_element_type=jnp.float32)
        xh_ref[...] = xh.astype(jnp.bfloat16)                    # [N, H*Fout]
        acol_ref[...] = jnp.dot(xb, a_ref[...],
                                preferred_element_type=jnp.float32)  # [N, 2H]

    row0 = pl.multiple_of(i * tm, tm)
    adj = adj_ref[...]                                   # [tm, N] bf16 mask
    is_edge = adj > 0

    acc = jnp.zeros((tm, fout), jnp.float32)
    for h in range(heads):                               # static unroll
        a_dst = acol_ref[pl.ds(row0, tm), pl.ds(heads + h, 1)]   # [tm, 1]
        a_src = jnp.transpose(acol_ref[:, pl.ds(h, 1)])          # [1, N]
        e = a_dst + a_src
        e = jnp.where(e > 0, e, negative_slope * e)      # LeakyReLU
        e = jnp.where(is_edge, e, -1e30)                 # mask non-edges
        m = jnp.max(e, axis=-1, keepdims=True)
        p = jnp.exp(e - m)
        p = jnp.where(is_edge, p, 0.0)
        denom = jnp.sum(p, axis=-1, keepdims=True)       # >= 1 (self loops)
        attn = (p * pl.reciprocal(denom, approx=True)).astype(jnp.bfloat16)
        xh_h = xh_ref[:, pl.ds(h * fout, fout)]          # [N, Fout] bf16
        acc = acc + jnp.dot(attn, xh_h, preferred_element_type=jnp.float32)

    acc = acc * (1.0 / heads)                            # concat=False -> mean
    if fout_pad > fout:                                  # lane-dense store
        acc = jnp.concatenate(
            [acc, jnp.zeros((tm, fout_pad - fout), jnp.float32)], axis=-1)
    out_ref[...] = (acc + bias_ref[...]).astype(out_ref.dtype)


def gat_conv(x_pad, adj, w, att_src, att_dst, bias, *, negative_slope=0.2):
    """Single GATConv layer (concat=False) as one pallas_call."""
    n, fin_pad = x_pad.shape
    heads, fin, fout = w.shape
    fout_pad = _round_up(fout, LANE)

    # Pack heads on lanes: W_all[:, h*Fout:(h+1)*Fout] = W_h (rows zero-padded
    # to the padded input width; padded x columns are exactly zero).
    w_all = jnp.transpose(w, (1, 0, 2)).reshape(fin, heads * fout)
    w_all = jnp.pad(w_all, ((0, fin_pad - fin), (0, 0))).astype(jnp.bfloat16)

    # Fold the attention vectors into matmul columns:
    #   (x @ A_all)[:, h]     = <x @ W_h, att_src_h>
    #   (x @ A_all)[:, H + h] = <x @ W_h, att_dst_h>
    a_src_col = jnp.einsum('hfo,ho->fh', w, att_src[:, 0, :])
    a_dst_col = jnp.einsum('hfo,ho->fh', w, att_dst[:, 0, :])
    a_all = jnp.concatenate([a_src_col, a_dst_col], axis=1)
    a_all = jnp.pad(a_all, ((0, fin_pad - fin), (0, 0))).astype(jnp.bfloat16)

    bias_pad = jnp.pad(bias, ((0, 0), (0, fout_pad - fout)))

    tm = _pick_row_tile(n)
    kernel = functools.partial(_gat_layer_kernel, heads=heads, fout=fout,
                               fout_pad=fout_pad,
                               negative_slope=negative_slope)
    return pl.pallas_call(
        kernel,
        out_shape=jax.ShapeDtypeStruct((n, fout_pad), x_pad.dtype),
        grid_spec=pltpu.PrefetchScalarGridSpec(
            num_scalar_prefetch=0,
            grid=(n // tm,),
            in_specs=[
                pl.BlockSpec((n, fin_pad), lambda i: (0, 0)),            # x
                pl.BlockSpec((fin_pad, heads * fout), lambda i: (0, 0)),  # W_all
                pl.BlockSpec((fin_pad, 2 * heads), lambda i: (0, 0)),     # A_all
                pl.BlockSpec((tm, n), lambda i: (i, 0)),                 # adj tile
                pl.BlockSpec((1, fout_pad), lambda i: (0, 0)),           # bias
            ],
            out_specs=pl.BlockSpec((tm, fout_pad), lambda i: (i, 0)),
            scratch_shapes=[
                pltpu.VMEM((n, heads * fout), jnp.bfloat16),  # xh (values)
                pltpu.VMEM((n, 2 * heads), jnp.float32),      # folded logits
            ],
        ),
        compiler_params=pltpu.CompilerParams(
            # scratch is filled at step 0 -> keep the row axis sequential.
            dimension_semantics=("arbitrary",)),
    )(x_pad, w_all, a_all, adj, bias_pad)


def dense_adj(edge_index, n):
    """adj[i, j] = 1 iff edge j -> i (self-loops added); bf16 mask."""
    src, dst = edge_index[0], edge_index[1]
    adj = jnp.zeros((n, n), jnp.float32).at[dst, src].set(1.0)
    adj = jnp.maximum(adj, jnp.eye(n, dtype=jnp.float32))
    return adj.astype(jnp.bfloat16)


def dcgat_encoder(features, edge_indexes, params, *, negative_slope=0.2):
    """Mirrors DCGATEncoder.forward: 3 GAT layers over hops 1, 3, 9."""
    n, fin = features.shape
    x = jnp.pad(features, ((0, 0), (0, _round_up(fin, LANE) - fin)))
    hop = 1
    fout = fin
    for i in range(len(params)):
        assert hop in edge_indexes
        w, a_s, a_d, b = params[i]
        fout = w.shape[-1]
        adj = dense_adj(edge_indexes[hop], n)
        x = gat_conv(x, adj, w, a_s, a_d, b, negative_slope=negative_slope)
        hop *= 3
    return x[:, :fout]                # strip the lane padding once, at the end


if __name__ == "__main__":
    key = jax.random.PRNGKey(0)

    # Small shapes consistent with the module (scaled down from the defaults
    # in_channels=100, out_channels=[64,32,16], heads=10).
    N = 16
    in_channels = 32
    out_channels = [16, 16, 8]
    heads = 4
    depth = 3
    negative_slope = 0.2
    num_edges = 40

    keys = jax.random.split(key, 4 + depth)

    # Deterministic parameter init (glorot-uniform weights / att vectors).
    params = []
    for i in range(depth):
        fin = in_channels if i == 0 else out_channels[i - 1]
        fout = out_channels[i]
        wk, ak1, ak2 = jax.random.split(keys[i], 3)
        w_scale = (6.0 / (fin + heads * fout)) ** 0.5
        w = jax.random.uniform(wk, (heads, fin, fout), jnp.float32,
                               -w_scale, w_scale)
        a_scale = (6.0 / (1 + fout)) ** 0.5
        att_src = jax.random.uniform(ak1, (heads, 1, fout), jnp.float32,
                                     -a_scale, a_scale)
        att_dst = jax.random.uniform(ak2, (heads, 1, fout), jnp.float32,
                                     -a_scale, a_scale)
        bias = jnp.zeros((1, fout), jnp.float32)
        params.append((w, att_src, att_dst, bias))

    # Node features.
    x = jax.random.normal(keys[depth], (N, in_channels), jnp.float32)

    # edge_indexes keyed by hop = 1, 3, 9 (each [2, E]; row 0 = src, row 1 = dst).
    edge_indexes = {}
    hop = 1
    for i in range(depth):
        ek = keys[depth + 1 + i]
        src = jax.random.randint(ek, (num_edges,), 0, N)
        dst = jax.random.randint(jax.random.fold_in(ek, 1), (num_edges,), 0, N)
        edge_indexes[hop] = jnp.stack([src, dst])
        hop *= 3

    encoder = jax.jit(functools.partial(dcgat_encoder,
                                        negative_slope=negative_slope))
    out = jax.block_until_ready(encoder(x, edge_indexes, params))
    assert out.shape == (N, out_channels[-1])
    assert bool(jnp.all(jnp.isfinite(out)))
    print("KERNEL_OK")
</pallas_src>

<mosaic_0001>
module attributes {stable_mosaic.version = 11 : i64} {
  func.func @_gat_layer_kernel(%arg0: i32, %arg1: memref<16x128xf32, #tpu.memory_space<vmem>>, %arg2: memref<128x64xbf16, #tpu.memory_space<vmem>>, %arg3: memref<128x8xbf16, #tpu.memory_space<vmem>>, %arg4: memref<16x16xbf16, #tpu.memory_space<vmem>>, %arg5: memref<1x128xf32, #tpu.memory_space<vmem>>, %arg6: memref<16x128xf32, #tpu.memory_space<vmem>>, %arg7: memref<16x64xbf16, #tpu.memory_space<vmem>>, %arg8: memref<16x8xf32, #tpu.memory_space<vmem>>) attributes {dimension_semantics = [#tpu.dimension_semantics<arbitrary>], iteration_bounds = array<i64: 1>, scalar_prefetch = 0 : i64, scratch_operands = 2 : i64, tpu.core_type = #tpu.core_type<tc>, window_params = [{pipeline_mode = #tpu.pipeline_mode<synchronous>, transform_indices = @transform_0, window_bounds = array<i64: 16, 128>}, {pipeline_mode = #tpu.pipeline_mode<synchronous>, transform_indices = @transform_1, window_bounds = array<i64: 128, 64>}, {pipeline_mode = #tpu.pipeline_mode<synchronous>, transform_indices = @transform_2, window_bounds = array<i64: 128, 8>}, {transform_indices = @transform_3, window_bounds = array<i64: 16, 16>}, {pipeline_mode = #tpu.pipeline_mode<synchronous>, transform_indices = @transform_4, window_bounds = array<i64: 1, 128>}, {transform_indices = @transform_5, window_bounds = array<i64: 16, 128>}]} {
    %c0_i32 = arith.constant 0 : i32
    %0 = arith.cmpi eq, %arg0, %c0_i32 : i32
    %1 = arith.extui %0 : i1 to i32
    %c0_i32_0 = arith.constant 0 : i32
    %2 = arith.cmpi ne, %1, %c0_i32_0 : i32
    scf.if %2 {
      %c0_47 = arith.constant 0 : index
      %c0_48 = arith.constant 0 : index
      %137 = vector.load %arg1[%c0_47, %c0_48] : memref<16x128xf32, #tpu.memory_space<vmem>>, vector<16x128xf32>
      %138 = arith.truncf %137 : vector<16x128xf32> to vector<16x128xbf16>
      %c0_49 = arith.constant 0 : index
      %c0_50 = arith.constant 0 : index
      %139 = vector.load %arg2[%c0_49, %c0_50] : memref<128x64xbf16, #tpu.memory_space<vmem>>, vector<128x64xbf16>
      %cst_51 = arith.constant dense<0.000000e+00> : vector<16x64xf32>
      %140 = tpu.matmul %138, %139, %cst_51 {dimension_numbers = #tpu.dot_dimension_numbers<[1], [0], [0], [1], [0, 0, 1, 1], [], []>} : vector<16x128xbf16>, vector<128x64xbf16>, vector<16x64xf32> -> vector<16x64xf32>
      %141 = arith.truncf %140 : vector<16x64xf32> to vector<16x64xbf16>
      %c0_52 = arith.constant 0 : index
      %c0_53 = arith.constant 0 : index
      %142 = vector.load %arg7[%c0_52, %c0_53] : memref<16x64xbf16, #tpu.memory_space<vmem>>, vector<16x64xbf16>
      tpu.vector_store %arg7[%c0_52, %c0_53], %141 {strides = array<i32>} : memref<16x64xbf16, #tpu.memory_space<vmem>>, vector<16x64xbf16>,
      %c0_54 = arith.constant 0 : index
      %c0_55 = arith.constant 0 : index
      %143 = vector.load %arg3[%c0_54, %c0_55] : memref<128x8xbf16, #tpu.memory_space<vmem>>, vector<128x8xbf16>
      %cst_56 = arith.constant dense<0.000000e+00> : vector<16x8xf32>
      %144 = tpu.matmul %138, %143, %cst_56 {dimension_numbers = #tpu.dot_dimension_numbers<[1], [0], [0], [1], [0, 0, 1, 1], [], []>} : vector<16x128xbf16>, vector<128x8xbf16>, vector<16x8xf32> -> vector<16x8xf32>
      %c0_57 = arith.constant 0 : index
      %c0_58 = arith.constant 0 : index
      %145 = vector.load %arg8[%c0_57, %c0_58] : memref<16x8xf32, #tpu.memory_space<vmem>>, vector<16x8xf32>
      tpu.vector_store %arg8[%c0_57, %c0_58], %144 {strides = array<i32>} : memref<16x8xf32, #tpu.memory_space<vmem>>, vector<16x8xf32>,
    } else {
    }
    %c16_i32 = arith.constant 16 : i32
    %3 = arith.muli %arg0, %c16_i32 : i32
    %4 = tpu.assume_multiple %3, 16 : i32
    %c0 = arith.constant 0 : index
    %c0_1 = arith.constant 0 : index
    %5 = vector.load %arg4[%c0, %c0_1] : memref<16x16xbf16, #tpu.memory_space<vmem>>, vector<16x16xbf16>
    %cst = arith.constant 0.000000e+00 : bf16
    %6 = vector.broadcast %cst : bf16 to vector<16x16xbf16>
    %7 = arith.cmpf ogt, %5, %6 : vector<16x16xbf16>
    %cst_2 = arith.constant 0.000000e+00 : f32
    %8 = vector.broadcast %cst_2 : f32 to vector<16x16xf32>
    %9 = arith.index_cast %4 : i32 to index
    %c4 = arith.constant 4 : index
    %10 = vector.load %arg8[%9, %c4] : memref<16x8xf32, #tpu.memory_space<vmem>>, vector<16x1xf32>
    %c0_3 = arith.constant 0 : index
    %c0_4 = arith.constant 0 : index
    %11 = vector.load %arg8[%c0_3, %c0_4] : memref<16x8xf32, #tpu.memory_space<vmem>>, vector<16x1xf32>
    %12 = tpu.transpose %11, [1, 0] : vector<16x1xf32> -> vector<1x16xf32>
    %13 = vector.broadcast %10 : vector<16x1xf32> to vector<16x16xf32>
    %14 = vector.broadcast %12 : vector<1x16xf32> to vector<16x16xf32>
    %15 = arith.addf %13, %14 : vector<16x16xf32>
    %cst_5 = arith.constant 0.000000e+00 : f32
    %16 = vector.broadcast %cst_5 : f32 to vector<16x16xf32>
    %17 = arith.cmpf ogt, %15, %16 : vector<16x16xf32>
    %cst_6 = arith.constant 2.000000e-01 : f32
    %18 = vector.broadcast %cst_6 : f32 to vector<16x16xf32>
    %19 = arith.mulf %18, %15 : vector<16x16xf32>
    %20 = arith.select %17, %15, %19 : vector<16x16xi1>, vector<16x16xf32>
    %cst_7 = arith.constant -1.000000e+30 : f32
    %21 = vector.broadcast %cst_7 : f32 to vector<16x16xf32>
    %22 = arith.select %7, %20, %21 : vector<16x16xi1>, vector<16x16xf32>
    %cst_8 = arith.constant dense<0xFF800000> : vector<16xf32>
    %23 = vector.multi_reduction <maximumf>, %22, %cst_8 [1] : vector<16x16xf32> to vector<16xf32>
    %24 = vector.shape_cast %23 : vector<16xf32> to vector<16x1xf32>
    %25 = vector.broadcast %24 : vector<16x1xf32> to vector<16x16xf32>
    %26 = arith.subf %22, %25 : vector<16x16xf32>
    %27 = math.exp %26 : vector<16x16xf32>
    %cst_9 = arith.constant 0.000000e+00 : f32
    %28 = vector.broadcast %cst_9 : f32 to vector<16x16xf32>
    %29 = arith.select %7, %27, %28 : vector<16x16xi1>, vector<16x16xf32>
    %cst_10 = arith.constant dense<0.000000e+00> : vector<16xf32>
    %30 = vector.multi_reduction <add>, %29, %cst_10 [1] : vector<16x16xf32> to vector<16xf32>
    %31 = vector.shape_cast %30 : vector<16xf32> to vector<16x1xf32>
    %32 = tpu.reciprocal %31 {approx = true} : vector<16x1xf32> -> vector<16x1xf32>
    %33 = vector.broadcast %32 : vector<16x1xf32> to vector<16x16xf32>
    %34 = arith.mulf %29, %33 : vector<16x16xf32>
    %35 = arith.truncf %34 : vector<16x16xf32> to vector<16x16xbf16>
    %c0_11 = arith.constant 0 : index
    %c0_12 = arith.constant 0 : index
    %36 = vector.load %arg7[%c0_11, %c0_12] : memref<16x64xbf16, #tpu.memory_space<vmem>>, vector<16x16xbf16>
    %cst_13 = arith.constant dense<0.000000e+00> : vector<16x16xf32>
    %37 = tpu.matmul %35, %36, %cst_13 {dimension_numbers = #tpu.dot_dimension_numbers<[1], [0], [0], [1], [0, 0, 1, 1], [], []>} : vector<16x16xbf16>, vector<16x16xbf16>, vector<16x16xf32> -> vector<16x16xf32>
    %38 = arith.addf %8, %37 : vector<16x16xf32>
    %39 = arith.index_cast %4 : i32 to index
    %c5 = arith.constant 5 : index
    %40 = vector.load %arg8[%39, %c5] : memref<16x8xf32, #tpu.memory_space<vmem>>, vector<16x1xf32>
    %c0_14 = arith.constant 0 : index
    %c1 = arith.constant 1 : index
    %41 = vector.load %arg8[%c0_14, %c1] : memref<16x8xf32, #tpu.memory_space<vmem>>, vector<16x1xf32>
    %42 = tpu.transpose %41, [1, 0] : vector<16x1xf32> -> vector<1x16xf32>
    %43 = vector.broadcast %40 : vector<16x1xf32> to vector<16x16xf32>
    %44 = vector.broadcast %42 : vector<1x16xf32> to vector<16x16xf32>
    %45 = arith.addf %43, %44 : vector<16x16xf32>
    %cst_15 = arith.constant 0.000000e+00 : f32
    %46 = vector.broadcast %cst_15 : f32 to vector<16x16xf32>
    %47 = arith.cmpf ogt, %45, %46 : vector<16x16xf32>
    %cst_16 = arith.constant 2.000000e-01 : f32
    %48 = vector.broadcast %cst_16 : f32 to vector<16x16xf32>
    %49 = arith.mulf %48, %45 : vector<16x16xf32>
    %50 = arith.select %47, %45, %49 : vector<16x16xi1>, vector<16x16xf32>
    %cst_17 = arith.constant -1.000000e+30 : f32
    %51 = vector.broadcast %cst_17 : f32 to vector<16x16xf32>
    %52 = arith.select %7, %50, %51 : vector<16x16xi1>, vector<16x16xf32>
    %cst_18 = arith.constant dense<0xFF800000> : vector<16xf32>
    %53 = vector.multi_reduction <maximumf>, %52, %cst_18 [1] : vector<16x16xf32> to vector<16xf32>
    %54 = vector.shape_cast %53 : vector<16xf32> to vector<16x1xf32>
    %55 = vector.broadcast %54 : vector<16x1xf32> to vector<16x16xf32>
    %56 = arith.subf %52, %55 : vector<16x16xf32>
    %57 = math.exp %56 : vector<16x16xf32>
    %cst_19 = arith.constant 0.000000e+00 : f32
    %58 = vector.broadcast %cst_19 : f32 to vector<16x16xf32>
    %59 = arith.select %7, %57, %58 : vector<16x16xi1>, vector<16x16xf32>
    %cst_20 = arith.constant dense<0.000000e+00> : vector<16xf32>
    %60 = vector.multi_reduction <add>, %59, %cst_20 [1] : vector<16x16xf32> to vector<16xf32>
    %61 = vector.shape_cast %60 : vector<16xf32> to vector<16x1xf32>
    %62 = tpu.reciprocal %61 {approx = true} : vector<16x1xf32> -> vector<16x1xf32>
    %63 = vector.broadcast %62 : vector<16x1xf32> to vector<16x16xf32>
    %64 = arith.mulf %59, %63 : vector<16x16xf32>
    %65 = arith.truncf %64 : vector<16x16xf32> to vector<16x16xbf16>
    %c0_21 = arith.constant 0 : index
    %c16 = arith.constant 16 : index
    %66 = vector.load %arg7[%c0_21, %c16] : memref<16x64xbf16, #tpu.memory_space<vmem>>, vector<16x16xbf16>
    %cst_22 = arith.constant dense<0.000000e+00> : vector<16x16xf32>
    %67 = tpu.matmul %65, %66, %cst_22 {dimension_numbers = #tpu.dot_dimension_numbers<[1], [0], [0], [1], [0, 0, 1, 1], [], []>} : vector<16x16xbf16>, vector<16x16xbf16>, vector<16x16xf32> -> vector<16x16xf32>
    %68 = arith.addf %38, %67 : vector<16x16xf32>
    %69 = arith.index_cast %4 : i32 to index
    %c6 = arith.constant 6 : index
    %70 = vector.load %arg8[%69, %c6] : memref<16x8xf32, #tpu.memory_space<vmem>>, vector<16x1xf32>
    %c0_23 = arith.constant 0 : index
    %c2 = arith.constant 2 : index
    %71 = vector.load %arg8[%c0_23, %c2] : memref<16x8xf32, #tpu.memory_space<vmem>>, vector<16x1xf32>
    %72 = tpu.transpose %71, [1, 0] : vector<16x1xf32> -> vector<1x16xf32>
    %73 = vector.broadcast %70 : vector<16x1xf32> to vector<16x16xf32>
    %74 = vector.broadcast %72 : vector<1x16xf32> to vector<16x16xf32>
    %75 = arith.addf %73, %74 : vector<16x16xf32>
    %cst_24 = arith.constant 0.000000e+00 : f32
    %76 = vector.broadcast %cst_24 : f32 to vector<16x16xf32>
    %77 = arith.cmpf ogt, %75, %76 : vector<16x16xf32>
    %cst_25 = arith.constant 2.000000e-01 : f32
    %78 = vector.broadcast %cst_25 : f32 to vector<16x16xf32>
    %79 = arith.mulf %78, %75 : vector<16x16xf32>
    %80 = arith.select %77, %75, %79 : vector<16x16xi1>, vector<16x16xf32>
    %cst_26 = arith.constant -1.000000e+30 : f32
    %81 = vector.broadcast %cst_26 : f32 to vector<16x16xf32>
    %82 = arith.select %7, %80, %81 : vector<16x16xi1>, vector<16x16xf32>
    %cst_27 = arith.constant dense<0xFF800000> : vector<16xf32>
    %83 = vector.multi_reduction <maximumf>, %82, %cst_27 [1] : vector<16x16xf32> to vector<16xf32>
    %84 = vector.shape_cast %83 : vector<16xf32> to vector<16x1xf32>
    %85 = vector.broadcast %84 : vector<16x1xf32> to vector<16x16xf32>
    %86 = arith.subf %82, %85 : vector<16x16xf32>
    %87 = math.exp %86 : vector<16x16xf32>
    %cst_28 = arith.constant 0.000000e+00 : f32
    %88 = vector.broadcast %cst_28 : f32 to vector<16x16xf32>
    %89 = arith.select %7, %87, %88 : vector<16x16xi1>, vector<16x16xf32>
    %cst_29 = arith.constant dense<0.000000e+00> : vector<16xf32>
    %90 = vector.multi_reduction <add>, %89, %cst_29 [1] : vector<16x16xf32> to vector<16xf32>
    %91 = vector.shape_cast %90 : vector<16xf32> to vector<16x1xf32>
    %92 = tpu.reciprocal %91 {approx = true} : vector<16x1xf32> -> vector<16x1xf32>
    %93 = vector.broadcast %92 : vector<16x1xf32> to vector<16x16xf32>
    %94 = arith.mulf %89, %93 : vector<16x16xf32>
    %95 = arith.truncf %94 : vector<16x16xf32> to vector<16x16xbf16>
    %c0_30 = arith.constant 0 : index
    %c32 = arith.constant 32 : index
    %96 = vector.load %arg7[%c0_30, %c32] : memref<16x64xbf16, #tpu.memory_space<vmem>>, vector<16x16xbf16>
    %cst_31 = arith.constant dense<0.000000e+00> : vector<16x16xf32>
    %97 = tpu.matmul %95, %96, %cst_31 {dimension_numbers = #tpu.dot_dimension_numbers<[1], [0], [0], [1], [0, 0, 1, 1], [], []>} : vector<16x16xbf16>, vector<16x16xbf16>, vector<16x16xf32> -> vector<16x16xf32>
    %98 = arith.addf %68, %97 : vector<16x16xf32>
    %99 = arith.index_cast %4 : i32 to index
    %c7 = arith.constant 7 : index
    %100 = vector.load %arg8[%99, %c7] : memref<16x8xf32, #tpu.memory_space<vmem>>, vector<16x1xf32>
    %c0_32 = arith.constant 0 : index
    %c3 = arith.constant 3 : index
    %101 = vector.load %arg8[%c0_32, %c3] : memref<16x8xf32, #tpu.memory_space<vmem>>, vector<16x1xf32>
    %102 = tpu.transpose %101, [1, 0] : vector<16x1xf32> -> vector<1x16xf32>
    %103 = vector.broadcast %100 : vector<16x1xf32> to vector<16x16xf32>
    %104 = vector.broadcast %102 : vector<1x16xf32> to vector<16x16xf32>
    %105 = arith.addf %103, %104 : vector<16x16xf32>
    %cst_33 = arith.constant 0.000000e+00 : f32
    %106 = vector.broadcast %cst_33 : f32 to vector<16x16xf32>
    %107 = arith.cmpf ogt, %105, %106 : vector<16x16xf32>
    %cst_34 = arith.constant 2.000000e-01 : f32
    %108 = vector.broadcast %cst_34 : f32 to vector<16x16xf32>
    %109 = arith.mulf %108, %105 : vector<16x16xf32>
    %110 = arith.select %107, %105, %109 : vector<16x16xi1>, vector<16x16xf32>
    %cst_35 = arith.constant -1.000000e+30 : f32
    %111 = vector.broadcast %cst_35 : f32 to vector<16x16xf32>
    %112 = arith.select %7, %110, %111 : vector<16x16xi1>, vector<16x16xf32>
    %cst_36 = arith.constant dense<0xFF800000> : vector<16xf32>
    %113 = vector.multi_reduction <maximumf>, %112, %cst_36 [1] : vector<16x16xf32> to vector<16xf32>
    %114 = vector.shape_cast %113 : vector<16xf32> to vector<16x1xf32>
    %115 = vector.broadcast %114 : vector<16x1xf32> to vector<16x16xf32>
    %116 = arith.subf %112, %115 : vector<16x16xf32>
    %117 = math.exp %116 : vector<16x16xf32>
    %cst_37 = arith.constant 0.000000e+00 : f32
    %118 = vector.broadcast %cst_37 : f32 to vector<16x16xf32>
    %119 = arith.select %7, %117, %118 : vector<16x16xi1>, vector<16x16xf32>
    %cst_38 = arith.constant dense<0.000000e+00> : vector<16xf32>
    %120 = vector.multi_reduction <add>, %119, %cst_38 [1] : vector<16x16xf32> to vector<16xf32>
    %121 = vector.shape_cast %120 : vector<16xf32> to vector<16x1xf32>
    %122 = tpu.reciprocal %121 {approx = true} : vector<16x1xf32> -> vector<16x1xf32>
    %123 = vector.broadcast %122 : vector<16x1xf32> to vector<16x16xf32>
    %124 = arith.mulf %119, %123 : vector<16x16xf32>
    %125 = arith.truncf %124 : vector<16x16xf32> to vector<16x16xbf16>
    %c0_39 = arith.constant 0 : index
    %c48 = arith.constant 48 : index
    %126 = vector.load %arg7[%c0_39, %c48] : memref<16x64xbf16, #tpu.memory_space<vmem>>, vector<16x16xbf16>
    %cst_40 = arith.constant dense<0.000000e+00> : vector<16x16xf32>
    %127 = tpu.matmul %125, %126, %cst_40 {dimension_numbers = #tpu.dot_dimension_numbers<[1], [0], [0], [1], [0, 0, 1, 1], [], []>} : vector<16x16xbf16>, vector<16x16xbf16>, vector<16x16xf32> -> vector<16x16xf32>
    %128 = arith.addf %98, %127 : vector<16x16xf32>
    %cst_41 = arith.constant 2.500000e-01 : f32
    %129 = vector.broadcast %cst_41 : f32 to vector<16x16xf32>
    %130 = arith.mulf %128, %129 : vector<16x16xf32>
    %cst_42 = arith.constant 0.000000e+00 : f32
    %131 = vector.broadcast %cst_42 : f32 to vector<16x112xf32>
    %132 = tpu.concatenate %130, %131 in 1 : vector<16x16xf32>, vector<16x112xf32> -> vector<16x128xf32>
    %c0_43 = arith.constant 0 : index
    %c0_44 = arith.constant 0 : index
    %133 = vector.load %arg5[%c0_43, %c0_44] : memref<1x128xf32, #tpu.memory_space<vmem>>, vector<1x128xf32>
    %134 = vector.broadcast %133 : vector<1x128xf32> to vector<16x128xf32>
    %135 = arith.addf %132, %134 : vector<16x128xf32>
    %c0_45 = arith.constant 0 : index
    %c0_46 = arith.constant 0 : index
    %136 = vector.load %arg6[%c0_45, %c0_46] : memref<16x128xf32, #tpu.memory_space<vmem>>, vector<16x128xf32>
    tpu.vector_store %arg6[%c0_45, %c0_46], %135 {strides = array<i32>} : memref<16x128xf32, #tpu.memory_space<vmem>>, vector<16x128xf32>,
    return
  }
  func.func @transform_0(%arg0: i32) -> (i32, i32) {
    %c0_i32 = arith.constant 0 : i32
    %c0_i32_0 = arith.constant 0 : i32
    %c0_i32_1 = arith.constant 0 : i32
    return %c0_i32, %c0_i32_0 : i32, i32
  }
  func.func @transform_1(%arg0: i32) -> (i32, i32) {
    %c0_i32 = arith.constant 0 : i32
    %c0_i32_0 = arith.constant 0 : i32
    %c0_i32_1 = arith.constant 0 : i32
    return %c0_i32, %c0_i32_0 : i32, i32
  }
  func.func @transform_2(%arg0: i32) -> (i32, i32) {
    %c0_i32 = arith.constant 0 : i32
    %c0_i32_0 = arith.constant 0 : i32
    %c0_i32_1 = arith.constant 0 : i32
    return %c0_i32, %c0_i32_0 : i32, i32
  }
  func.func @transform_3(%arg0: i32) -> (i32, i32) {
    %c0_i32 = arith.constant 0 : i32
    %c0_i32_0 = arith.constant 0 : i32
    return %arg0, %c0_i32 : i32, i32
  }
  func.func @transform_4(%arg0: i32) -> (i32, i32) {
    %c0_i32 = arith.constant 0 : i32
    %c0_i32_0 = arith.constant 0 : i32
    %c0_i32_1 = arith.constant 0 : i32
    return %c0_i32, %c0_i32_0 : i32, i32
  }
  func.func @transform_5(%arg0: i32) -> (i32, i32) {
    %c0_i32 = arith.constant 0 : i32
    %c0_i32_0 = arith.constant 0 : i32
    return %arg0, %c0_i32 : i32, i32
  }
}

module attributes {stable_mosaic.version = 11 : i64} {
  func.func @_gat_layer_kernel(%arg0: i32, %arg1: memref<16x128xf32, #tpu.memory_space<vmem>>, %arg2: memref<128x32xbf16, #tpu.memory_space<vmem>>, %arg3: memref<128x8xbf16, #tpu.memory_space<vmem>>, %arg4: memref<16x16xbf16, #tpu.memory_space<vmem>>, %arg5: memref<1x128xf32, #tpu.memory_space<vmem>>, %arg6: memref<16x128xf32, #tpu.memory_space<vmem>>, %arg7: memref<16x32xbf16, #tpu.memory_space<vmem>>, %arg8: memref<16x8xf32, #tpu.memory_space<vmem>>) attributes {dimension_semantics = [#tpu.dimension_semantics<arbitrary>], iteration_bounds = array<i64: 1>, scalar_prefetch = 0 : i64, scratch_operands = 2 : i64, tpu.core_type = #tpu.core_type<tc>, window_params = [{pipeline_mode = #tpu.pipeline_mode<synchronous>, transform_indices = @transform_0, window_bounds = array<i64: 16, 128>}, {pipeline_mode = #tpu.pipeline_mode<synchronous>, transform_indices = @transform_1, window_bounds = array<i64: 128, 32>}, {pipeline_mode = #tpu.pipeline_mode<synchronous>, transform_indices = @transform_2, window_bounds = array<i64: 128, 8>}, {transform_indices = @transform_3, window_bounds = array<i64: 16, 16>}, {pipeline_mode = #tpu.pipeline_mode<synchronous>, transform_indices = @transform_4, window_bounds = array<i64: 1, 128>}, {transform_indices = @transform_5, window_bounds = array<i64: 16, 128>}]} {
    %c0_i32 = arith.constant 0 : i32
    %0 = arith.cmpi eq, %arg0, %c0_i32 : i32
    %1 = arith.extui %0 : i1 to i32
    %c0_i32_0 = arith.constant 0 : i32
    %2 = arith.cmpi ne, %1, %c0_i32_0 : i32
    scf.if %2 {
      %c0_47 = arith.constant 0 : index
      %c0_48 = arith.constant 0 : index
      %137 = vector.load %arg1[%c0_47, %c0_48] : memref<16x128xf32, #tpu.memory_space<vmem>>, vector<16x128xf32>
      %138 = arith.truncf %137 : vector<16x128xf32> to vector<16x128xbf16>
      %c0_49 = arith.constant 0 : index
      %c0_50 = arith.constant 0 : index
      %139 = vector.load %arg2[%c0_49, %c0_50] : memref<128x32xbf16, #tpu.memory_space<vmem>>, vector<128x32xbf16>
      %cst_51 = arith.constant dense<0.000000e+00> : vector<16x32xf32>
      %140 = tpu.matmul %138, %139, %cst_51 {dimension_numbers = #tpu.dot_dimension_numbers<[1], [0], [0], [1], [0, 0, 1, 1], [], []>} : vector<16x128xbf16>, vector<128x32xbf16>, vector<16x32xf32> -> vector<16x32xf32>
      %141 = arith.truncf %140 : vector<16x32xf32> to vector<16x32xbf16>
      %c0_52 = arith.constant 0 : index
      %c0_53 = arith.constant 0 : index
      %142 = vector.load %arg7[%c0_52, %c0_53] : memref<16x32xbf16, #tpu.memory_space<vmem>>, vector<16x32xbf16>
      tpu.vector_store %arg7[%c0_52, %c0_53], %141 {strides = array<i32>} : memref<16x32xbf16, #tpu.memory_space<vmem>>, vector<16x32xbf16>,
      %c0_54 = arith.constant 0 : index
      %c0_55 = arith.constant 0 : index
      %143 = vector.load %arg3[%c0_54, %c0_55] : memref<128x8xbf16, #tpu.memory_space<vmem>>, vector<128x8xbf16>
      %cst_56 = arith.constant dense<0.000000e+00> : vector<16x8xf32>
      %144 = tpu.matmul %138, %143, %cst_56 {dimension_numbers = #tpu.dot_dimension_numbers<[1], [0], [0], [1], [0, 0, 1, 1], [], []>} : vector<16x128xbf16>, vector<128x8xbf16>, vector<16x8xf32> -> vector<16x8xf32>
      %c0_57 = arith.constant 0 : index
      %c0_58 = arith.constant 0 : index
      %145 = vector.load %arg8[%c0_57, %c0_58] : memref<16x8xf32, #tpu.memory_space<vmem>>, vector<16x8xf32>
      tpu.vector_store %arg8[%c0_57, %c0_58], %144 {strides = array<i32>} : memref<16x8xf32, #tpu.memory_space<vmem>>, vector<16x8xf32>,
    } else {
    }
    %c16_i32 = arith.constant 16 : i32
    %3 = arith.muli %arg0, %c16_i32 : i32
    %4 = tpu.assume_multiple %3, 16 : i32
    %c0 = arith.constant 0 : index
    %c0_1 = arith.constant 0 : index
    %5 = vector.load %arg4[%c0, %c0_1] : memref<16x16xbf16, #tpu.memory_space<vmem>>, vector<16x16xbf16>
    %cst = arith.constant 0.000000e+00 : bf16
    %6 = vector.broadcast %cst : bf16 to vector<16x16xbf16>
    %7 = arith.cmpf ogt, %5, %6 : vector<16x16xbf16>
    %cst_2 = arith.constant 0.000000e+00 : f32
    %8 = vector.broadcast %cst_2 : f32 to vector<16x8xf32>
    %9 = arith.index_cast %4 : i32 to index
    %c4 = arith.constant 4 : index
    %10 = vector.load %arg8[%9, %c4] : memref<16x8xf32, #tpu.memory_space<vmem>>, vector<16x1xf32>
    %c0_3 = arith.constant 0 : index
    %c0_4 = arith.constant 0 : index
    %11 = vector.load %arg8[%c0_3, %c0_4] : memref<16x8xf32, #tpu.memory_space<vmem>>, vector<16x1xf32>
    %12 = tpu.transpose %11, [1, 0] : vector<16x1xf32> -> vector<1x16xf32>
    %13 = vector.broadcast %10 : vector<16x1xf32> to vector<16x16xf32>
    %14 = vector.broadcast %12 : vector<1x16xf32> to vector<16x16xf32>
    %15 = arith.addf %13, %14 : vector<16x16xf32>
    %cst_5 = arith.constant 0.000000e+00 : f32
    %16 = vector.broadcast %cst_5 : f32 to vector<16x16xf32>
    %17 = arith.cmpf ogt, %15, %16 : vector<16x16xf32>
    %cst_6 = arith.constant 2.000000e-01 : f32
    %18 = vector.broadcast %cst_6 : f32 to vector<16x16xf32>
    %19 = arith.mulf %18, %15 : vector<16x16xf32>
    %20 = arith.select %17, %15, %19 : vector<16x16xi1>, vector<16x16xf32>
    %cst_7 = arith.constant -1.000000e+30 : f32
    %21 = vector.broadcast %cst_7 : f32 to vector<16x16xf32>
    %22 = arith.select %7, %20, %21 : vector<16x16xi1>, vector<16x16xf32>
    %cst_8 = arith.constant dense<0xFF800000> : vector<16xf32>
    %23 = vector.multi_reduction <maximumf>, %22, %cst_8 [1] : vector<16x16xf32> to vector<16xf32>
    %24 = vector.shape_cast %23 : vector<16xf32> to vector<16x1xf32>
    %25 = vector.broadcast %24 : vector<16x1xf32> to vector<16x16xf32>
    %26 = arith.subf %22, %25 : vector<16x16xf32>
    %27 = math.exp %26 : vector<16x16xf32>
    %cst_9 = arith.constant 0.000000e+00 : f32
    %28 = vector.broadcast %cst_9 : f32 to vector<16x16xf32>
    %29 = arith.select %7, %27, %28 : vector<16x16xi1>, vector<16x16xf32>
    %cst_10 = arith.constant dense<0.000000e+00> : vector<16xf32>
    %30 = vector.multi_reduction <add>, %29, %cst_10 [1] : vector<16x16xf32> to vector<16xf32>
    %31 = vector.shape_cast %30 : vector<16xf32> to vector<16x1xf32>
    %32 = tpu.reciprocal %31 {approx = true} : vector<16x1xf32> -> vector<16x1xf32>
    %33 = vector.broadcast %32 : vector<16x1xf32> to vector<16x16xf32>
    %34 = arith.mulf %29, %33 : vector<16x16xf32>
    %35 = arith.truncf %34 : vector<16x16xf32> to vector<16x16xbf16>
    %c0_11 = arith.constant 0 : index
    %c0_12 = arith.constant 0 : index
    %36 = vector.load %arg7[%c0_11, %c0_12] : memref<16x32xbf16, #tpu.memory_space<vmem>>, vector<16x8xbf16>
    %cst_13 = arith.constant dense<0.000000e+00> : vector<16x8xf32>
    %37 = tpu.matmul %35, %36, %cst_13 {dimension_numbers = #tpu.dot_dimension_numbers<[1], [0], [0], [1], [0, 0, 1, 1], [], []>} : vector<16x16xbf16>, vector<16x8xbf16>, vector<16x8xf32> -> vector<16x8xf32>
    %38 = arith.addf %8, %37 : vector<16x8xf32>
    %39 = arith.index_cast %4 : i32 to index
    %c5 = arith.constant 5 : index
    %40 = vector.load %arg8[%39, %c5] : memref<16x8xf32, #tpu.memory_space<vmem>>, vector<16x1xf32>
    %c0_14 = arith.constant 0 : index
    %c1 = arith.constant 1 : index
    %41 = vector.load %arg8[%c0_14, %c1] : memref<16x8xf32, #tpu.memory_space<vmem>>, vector<16x1xf32>
    %42 = tpu.transpose %41, [1, 0] : vector<16x1xf32> -> vector<1x16xf32>
    %43 = vector.broadcast %40 : vector<16x1xf32> to vector<16x16xf32>
    %44 = vector.broadcast %42 : vector<1x16xf32> to vector<16x16xf32>
    %45 = arith.addf %43, %44 : vector<16x16xf32>
    %cst_15 = arith.constant 0.000000e+00 : f32
    %46 = vector.broadcast %cst_15 : f32 to vector<16x16xf32>
    %47 = arith.cmpf ogt, %45, %46 : vector<16x16xf32>
    %cst_16 = arith.constant 2.000000e-01 : f32
    %48 = vector.broadcast %cst_16 : f32 to vector<16x16xf32>
    %49 = arith.mulf %48, %45 : vector<16x16xf32>
    %50 = arith.select %47, %45, %49 : vector<16x16xi1>, vector<16x16xf32>
    %cst_17 = arith.constant -1.000000e+30 : f32
    %51 = vector.broadcast %cst_17 : f32 to vector<16x16xf32>
    %52 = arith.select %7, %50, %51 : vector<16x16xi1>, vector<16x16xf32>
    %cst_18 = arith.constant dense<0xFF800000> : vector<16xf32>
    %53 = vector.multi_reduction <maximumf>, %52, %cst_18 [1] : vector<16x16xf32> to vector<16xf32>
    %54 = vector.shape_cast %53 : vector<16xf32> to vector<16x1xf32>
    %55 = vector.broadcast %54 : vector<16x1xf32> to vector<16x16xf32>
    %56 = arith.subf %52, %55 : vector<16x16xf32>
    %57 = math.exp %56 : vector<16x16xf32>
    %cst_19 = arith.constant 0.000000e+00 : f32
    %58 = vector.broadcast %cst_19 : f32 to vector<16x16xf32>
    %59 = arith.select %7, %57, %58 : vector<16x16xi1>, vector<16x16xf32>
    %cst_20 = arith.constant dense<0.000000e+00> : vector<16xf32>
    %60 = vector.multi_reduction <add>, %59, %cst_20 [1] : vector<16x16xf32> to vector<16xf32>
    %61 = vector.shape_cast %60 : vector<16xf32> to vector<16x1xf32>
    %62 = tpu.reciprocal %61 {approx = true} : vector<16x1xf32> -> vector<16x1xf32>
    %63 = vector.broadcast %62 : vector<16x1xf32> to vector<16x16xf32>
    %64 = arith.mulf %59, %63 : vector<16x16xf32>
    %65 = arith.truncf %64 : vector<16x16xf32> to vector<16x16xbf16>
    %c0_21 = arith.constant 0 : index
    %c8 = arith.constant 8 : index
    %66 = vector.load %arg7[%c0_21, %c8] : memref<16x32xbf16, #tpu.memory_space<vmem>>, vector<16x8xbf16>
    %cst_22 = arith.constant dense<0.000000e+00> : vector<16x8xf32>
    %67 = tpu.matmul %65, %66, %cst_22 {dimension_numbers = #tpu.dot_dimension_numbers<[1], [0], [0], [1], [0, 0, 1, 1], [], []>} : vector<16x16xbf16>, vector<16x8xbf16>, vector<16x8xf32> -> vector<16x8xf32>
    %68 = arith.addf %38, %67 : vector<16x8xf32>
    %69 = arith.index_cast %4 : i32 to index
    %c6 = arith.constant 6 : index
    %70 = vector.load %arg8[%69, %c6] : memref<16x8xf32, #tpu.memory_space<vmem>>, vector<16x1xf32>
    %c0_23 = arith.constant 0 : index
    %c2 = arith.constant 2 : index
    %71 = vector.load %arg8[%c0_23, %c2] : memref<16x8xf32, #tpu.memory_space<vmem>>, vector<16x1xf32>
    %72 = tpu.transpose %71, [1, 0] : vector<16x1xf32> -> vector<1x16xf32>
    %73 = vector.broadcast %70 : vector<16x1xf32> to vector<16x16xf32>
    %74 = vector.broadcast %72 : vector<1x16xf32> to vector<16x16xf32>
    %75 = arith.addf %73, %74 : vector<16x16xf32>
    %cst_24 = arith.constant 0.000000e+00 : f32
    %76 = vector.broadcast %cst_24 : f32 to vector<16x16xf32>
    %77 = arith.cmpf ogt, %75, %76 : vector<16x16xf32>
    %cst_25 = arith.constant 2.000000e-01 : f32
    %78 = vector.broadcast %cst_25 : f32 to vector<16x16xf32>
    %79 = arith.mulf %78, %75 : vector<16x16xf32>
    %80 = arith.select %77, %75, %79 : vector<16x16xi1>, vector<16x16xf32>
    %cst_26 = arith.constant -1.000000e+30 : f32
    %81 = vector.broadcast %cst_26 : f32 to vector<16x16xf32>
    %82 = arith.select %7, %80, %81 : vector<16x16xi1>, vector<16x16xf32>
    %cst_27 = arith.constant dense<0xFF800000> : vector<16xf32>
    %83 = vector.multi_reduction <maximumf>, %82, %cst_27 [1] : vector<16x16xf32> to vector<16xf32>
    %84 = vector.shape_cast %83 : vector<16xf32> to vector<16x1xf32>
    %85 = vector.broadcast %84 : vector<16x1xf32> to vector<16x16xf32>
    %86 = arith.subf %82, %85 : vector<16x16xf32>
    %87 = math.exp %86 : vector<16x16xf32>
    %cst_28 = arith.constant 0.000000e+00 : f32
    %88 = vector.broadcast %cst_28 : f32 to vector<16x16xf32>
    %89 = arith.select %7, %87, %88 : vector<16x16xi1>, vector<16x16xf32>
    %cst_29 = arith.constant dense<0.000000e+00> : vector<16xf32>
    %90 = vector.multi_reduction <add>, %89, %cst_29 [1] : vector<16x16xf32> to vector<16xf32>
    %91 = vector.shape_cast %90 : vector<16xf32> to vector<16x1xf32>
    %92 = tpu.reciprocal %91 {approx = true} : vector<16x1xf32> -> vector<16x1xf32>
    %93 = vector.broadcast %92 : vector<16x1xf32> to vector<16x16xf32>
    %94 = arith.mulf %89, %93 : vector<16x16xf32>
    %95 = arith.truncf %94 : vector<16x16xf32> to vector<16x16xbf16>
    %c0_30 = arith.constant 0 : index
    %c16 = arith.constant 16 : index
    %96 = vector.load %arg7[%c0_30, %c16] : memref<16x32xbf16, #tpu.memory_space<vmem>>, vector<16x8xbf16>
    %cst_31 = arith.constant dense<0.000000e+00> : vector<16x8xf32>
    %97 = tpu.matmul %95, %96, %cst_31 {dimension_numbers = #tpu.dot_dimension_numbers<[1], [0], [0], [1], [0, 0, 1, 1], [], []>} : vector<16x16xbf16>, vector<16x8xbf16>, vector<16x8xf32> -> vector<16x8xf32>
    %98 = arith.addf %68, %97 : vector<16x8xf32>
    %99 = arith.index_cast %4 : i32 to index
    %c7 = arith.constant 7 : index
    %100 = vector.load %arg8[%99, %c7] : memref<16x8xf32, #tpu.memory_space<vmem>>, vector<16x1xf32>
    %c0_32 = arith.constant 0 : index
    %c3 = arith.constant 3 : index
    %101 = vector.load %arg8[%c0_32, %c3] : memref<16x8xf32, #tpu.memory_space<vmem>>, vector<16x1xf32>
    %102 = tpu.transpose %101, [1, 0] : vector<16x1xf32> -> vector<1x16xf32>
    %103 = vector.broadcast %100 : vector<16x1xf32> to vector<16x16xf32>
    %104 = vector.broadcast %102 : vector<1x16xf32> to vector<16x16xf32>
    %105 = arith.addf %103, %104 : vector<16x16xf32>
    %cst_33 = arith.constant 0.000000e+00 : f32
    %106 = vector.broadcast %cst_33 : f32 to vector<16x16xf32>
    %107 = arith.cmpf ogt, %105, %106 : vector<16x16xf32>
    %cst_34 = arith.constant 2.000000e-01 : f32
    %108 = vector.broadcast %cst_34 : f32 to vector<16x16xf32>
    %109 = arith.mulf %108, %105 : vector<16x16xf32>
    %110 = arith.select %107, %105, %109 : vector<16x16xi1>, vector<16x16xf32>
    %cst_35 = arith.constant -1.000000e+30 : f32
    %111 = vector.broadcast %cst_35 : f32 to vector<16x16xf32>
    %112 = arith.select %7, %110, %111 : vector<16x16xi1>, vector<16x16xf32>
    %cst_36 = arith.constant dense<0xFF800000> : vector<16xf32>
    %113 = vector.multi_reduction <maximumf>, %112, %cst_36 [1] : vector<16x16xf32> to vector<16xf32>
    %114 = vector.shape_cast %113 : vector<16xf32> to vector<16x1xf32>
    %115 = vector.broadcast %114 : vector<16x1xf32> to vector<16x16xf32>
    %116 = arith.subf %112, %115 : vector<16x16xf32>
    %117 = math.exp %116 : vector<16x16xf32>
    %cst_37 = arith.constant 0.000000e+00 : f32
    %118 = vector.broadcast %cst_37 : f32 to vector<16x16xf32>
    %119 = arith.select %7, %117, %118 : vector<16x16xi1>, vector<16x16xf32>
    %cst_38 = arith.constant dense<0.000000e+00> : vector<16xf32>
    %120 = vector.multi_reduction <add>, %119, %cst_38 [1] : vector<16x16xf32> to vector<16xf32>
    %121 = vector.shape_cast %120 : vector<16xf32> to vector<16x1xf32>
    %122 = tpu.reciprocal %121 {approx = true} : vector<16x1xf32> -> vector<16x1xf32>
    %123 = vector.broadcast %122 : vector<16x1xf32> to vector<16x16xf32>
    %124 = arith.mulf %119, %123 : vector<16x16xf32>
    %125 = arith.truncf %124 : vector<16x16xf32> to vector<16x16xbf16>
    %c0_39 = arith.constant 0 : index
    %c24 = arith.constant 24 : index
    %126 = vector.load %arg7[%c0_39, %c24] : memref<16x32xbf16, #tpu.memory_space<vmem>>, vector<16x8xbf16>
    %cst_40 = arith.constant dense<0.000000e+00> : vector<16x8xf32>
    %127 = tpu.matmul %125, %126, %cst_40 {dimension_numbers = #tpu.dot_dimension_numbers<[1], [0], [0], [1], [0, 0, 1, 1], [], []>} : vector<16x16xbf16>, vector<16x8xbf16>, vector<16x8xf32> -> vector<16x8xf32>
    %128 = arith.addf %98, %127 : vector<16x8xf32>
    %cst_41 = arith.constant 2.500000e-01 : f32
    %129 = vector.broadcast %cst_41 : f32 to vector<16x8xf32>
    %130 = arith.mulf %128, %129 : vector<16x8xf32>
    %cst_42 = arith.constant 0.000000e+00 : f32
    %131 = vector.broadcast %cst_42 : f32 to vector<16x120xf32>
    %132 = tpu.concatenate %130, %131 in 1 : vector<16x8xf32>, vector<16x120xf32> -> vector<16x128xf32>
    %c0_43 = arith.constant 0 : index
    %c0_44 = arith.constant 0 : index
    %133 = vector.load %arg5[%c0_43, %c0_44] : memref<1x128xf32, #tpu.memory_space<vmem>>, vector<1x128xf32>
    %134 = vector.broadcast %133 : vector<1x128xf32> to vector<16x128xf32>
    %135 = arith.addf %132, %134 : vector<16x128xf32>
    %c0_45 = arith.constant 0 : index
    %c0_46 = arith.constant 0 : index
    %136 = vector.load %arg6[%c0_45, %c0_46] : memref<16x128xf32, #tpu.memory_space<vmem>>, vector<16x128xf32>
    tpu.vector_store %arg6[%c0_45, %c0_46], %135 {strides = array<i32>} : memref<16x128xf32, #tpu.memory_space<vmem>>, vector<16x128xf32>,
    return
  }
  func.func @transform_0(%arg0: i32) -> (i32, i32) {
    %c0_i32 = arith.constant 0 : i32
    %c0_i32_0 = arith.constant 0 : i32
    %c0_i32_1 = arith.constant 0 : i32
    return %c0_i32, %c0_i32_0 : i32, i32
  }
  func.func @transform_1(%arg0: i32) -> (i32, i32) {
    %c0_i32 = arith.constant 0 : i32
    %c0_i32_0 = arith.constant 0 : i32
    %c0_i32_1 = arith.constant 0 : i32
    return %c0_i32, %c0_i32_0 : i32, i32
  }
  func.func @transform_2(%arg0: i32) -> (i32, i32) {
    %c0_i32 = arith.constant 0 : i32
    %c0_i32_0 = arith.constant 0 : i32
    %c0_i32_1 = arith.constant 0 : i32
    return %c0_i32, %c0_i32_0 : i32, i32
  }
  func.func @transform_3(%arg0: i32) -> (i32, i32) {
    %c0_i32 = arith.constant 0 : i32
    %c0_i32_0 = arith.constant 0 : i32
    return %arg0, %c0_i32 : i32, i32
  }
  func.func @transform_4(%arg0: i32) -> (i32, i32) {
    %c0_i32 = arith.constant 0 : i32
    %c0_i32_0 = arith.constant 0 : i32
    %c0_i32_1 = arith.constant 0 : i32
    return %c0_i32, %c0_i32_0 : i32, i32
  }
  func.func @transform_5(%arg0: i32) -> (i32, i32) {
    %c0_i32 = arith.constant 0 : i32
    %c0_i32_0 = arith.constant 0 : i32
    return %arg0, %c0_i32 : i32, i32
  }
}

</mosaic_0001>

<bundles_post_ra>
// kernel: dcgat_encoder.3
= control target key start
LH: loop header
LB: loop body
LE: loop exit
PB: predicated region body
PF: predicated region fallthrough
CT: control target
= control target key end

     0   :  { %v782_v11 = vmov 4   ;;  %v783_v12 = vmov 5   ;;  %vm189_vm0 = vcmask 64512   ;;  %s785_s13 = smov 126   ;;  %v787_v16 = vmov 6   ;;  %s790_s6 = smov 96   ;;  %s991_s2 = inlined_call_operand.vmem [shape: bf16[128,8], index: 2, kind: input, shape index: {}]   ;;  %s992_s0 = inlined_call_operand.vmem [shape: f32[16,128], index: 0, kind: input, shape index: {}]   ;;  %s993_s1 = inlined_call_operand.vmem [shape: bf16[128,64], index: 1, kind: input, shape index: {}]   ;;  %s994_s3 = inlined_call_operand.vmem [shape: bf16[16,16], index: 3, kind: input, shape index: {}]   ;;  %s995_s4 = inlined_call_operand.vmem [shape: f32[1,128], index: 4, kind: input, shape index: {}]   ;;  %s996_s5 = inlined_call_operand.vmem [shape: f32[16,128], index: 5, kind: output, shape index: {}]  }
   0x1   :  { %v723_v0 = vld [vmem:[%s991_s2 + $0x38] sm:$0xff]  ;;  %v722_v1 = vld [vmem:[%s991_s2 + $0x30] sm:$0xff]  ;;  %v721_v2 = vld [vmem:[%s991_s2 + $0x28] sm:$0xff]  ;;  %740 = vset.pattern.permute.xlu1 %v782_v11  ;;  %741 = vset.pattern.permute.xlu2 %v783_v12  ;;  %v788_v18 = vmov 7   ;;  %vm257_vm3 = vcmask 130048   ;;  %vm108_vm12 = vcmask 519168  }
   0x2   :  { %175 = vmatpush.bf16.msra.mxu1 %v723_v0  ;;  %v720_v3 = vld [vmem:[%s991_s2 + $0x20] sm:$0xff]  ;;  %v719_v4 = vld [vmem:[%s991_s2 + $0x18] sm:$0xff]  ;;  %v718_v5 = vld [vmem:[%s991_s2 + $0x10] sm:$0xff]  ;;  %s791_s7 = smov 80  }
   0x3   :  { %v717_v6 = vld [vmem:[%s991_s2 + $0x8] sm:$0xff]  ;;  %v716_v7 = vld [vmem:[%s991_s2] sm:$0xff]  ;;  %s784_s2 = smov 125   ;;  %v715_v29 = vld [vmem:[%s993_s1 + $0x38] sm:$0xff] }
   0x4   :  { %v25_v8 = vld [vmem:[%s992_s0] sm:$0xff]  ;;  %v26_v9 = vld [vmem:[%s992_s0 + $0x8] sm:$0xff]  ;;  %s786_s0 = smov 127   ;;  %92 = vmatpush.bf16.msra.mxu0 %v715_v29  ;;  %v714_v30 = vld [vmem:[%s993_s1 + $0x30] sm:$0xff] }
   0x5   :  { %v852_v10 = vpack.c.bf16 %v26_v9, %v25_v8  ;;  %v726_v32 = vld [vmem:[%s994_s3] sm:$0xff]   ;;  %v713_v50 = vld [vmem:[%s993_s1 + $0x28] sm:$0xff]  ;;  %v711_v52 = vld [vmem:[%s993_s1 + $0x18] sm:$0xff] }
   0x6   :  { %176 = vmatpush.bf16.msra.mxu1 %v722_v1  ;;  %v727_v35 = vunpack.c.l.bf16 %v726_v32  ;;  %v728_v42 = vunpack.c.h.bf16 %v726_v32  ;;  %v712_v51 = vld [vmem:[%s993_s1 + $0x20] sm:$0xff]  ;;  %v710_v53 = vld [vmem:[%s993_s1 + $0x10] sm:$0xff]  ;;  %v709_v54 = vld [vmem:[%s993_s1 + $0x8] sm:$0xff] }
   0x7   :  { %v708_v55 = vld [vmem:[%s993_s1] sm:$0xff]  ;;  %s789_s1 = smov 112  }
   0x8   :  { %93 = vmatpush.bf16.msra.mxu0 %v714_v30  ;;  %vm870_vm1 = vcmp.gt.f32.partialorder %v727_v35, 0.0  ;;  %vm880_vm5 = vcmp.gt.f32.partialorder %v728_v42, 0.0 }
   0xa   :  { %177 = vmatpush.bf16.msra.mxu1 %v721_v2 }
   0xc   :  { %94 = vmatpush.bf16.msra.mxu0 %v713_v50 }
   0xe   :  { %178 = vmatpush.bf16.msra.mxu1 %v720_v3 }
  0x10   :  { %95 = vmatpush.bf16.msra.mxu0 %v712_v51 }
  0x12   :  { %179 = vmatpush.bf16.msra.mxu1 %v719_v4 }
  0x14   :  { %96 = vmatpush.bf16.msra.mxu0 %v711_v52 }
  0x16   :  { %180 = vmatpush.bf16.msra.mxu1 %v718_v5 }
  0x18   :  { %97 = vmatpush.bf16.msra.mxu0 %v710_v53 }
  0x1a   :  { %181 = vmatpush.bf16.msra.mxu1 %v717_v6 }
  0x1c   :  { %98 = vmatpush.bf16.msra.mxu0 %v709_v54 }
  0x1e   :  { %182 = vmatpush.bf16.msra.mxu1 %v716_v7 }
  0x20   :  { %99 = vmatpush.bf16.msra.mxu0 %v708_v55 }
  0x21   :  { %183 = vmatmul.bf16.vlgmr.msra.gmra.mxu1 %v852_v10 }
  0x23   :  { %100 = vmatmul.bf16.vlgmr.msra.gmra.mxu0 %v852_v10 }
  0x9e   :  { %v184_v13 = vpop.f32.mrf.mxu1 }
  0x9f   :  { %190 = vst.msk [vmem:[#allocation3] sm:$0xff] %vm189_vm0, %v184_v13 }
  0xa6   :  { %v186_v14 = vpop.f32.mrf.mxu1  ;;  %v202_v15 = vld [vmem:[#allocation3] sm:$0xff] }
  0xa7   :  { %191 = vst.msk [vmem:[#allocation3 + $0x8] sm:$0xff] %vm189_vm0, %v186_v14  ;;  %516 = vrot.lane.b32.xlu0 %v202_v15, %s784_s2  ;;  %412 = vrot.lane.b32.xlu2 %v202_v15, %s785_s13 }
  0xa8   :  { %238 = vperm.xlu1 %740, %v202_v15  }
  0xae   :  { %v203_v17 = vld [vmem:[#allocation3 + $0x8] sm:$0xff] }
  0xaf   :  { %326 = vperm.xlu2 %741, %v202_v15  }
  0xb0   :  { %287 = vrot.lane.b32.xlu1 %v202_v15, %s786_s0 }
  0xb1   :  { %744 = vset.pattern.permute.xlu1 %v783_v12 }
  0xb7   :  { %742 = vset.pattern.permute.xlu2 %v787_v16 }
  0xb8   :  { %414 = vrot.lane.b32.xlu1 %v203_v17, %s785_s13  ;;  %451 = vperm.xlu2 %742, %v202_v15  }
  0xc0   :  { %330 = vperm.xlu1 %744, %v203_v17   ;;  %743 = vset.pattern.permute.xlu2 %v788_v18 }
  0xc1   :  { %555 = vperm.xlu2 %743, %v202_v15  }
  0xc8   :  { %745 = vset.pattern.permute.xlu1 %v782_v11 }
  0xc9   :  { %243 = vperm.xlu1 %745, %v203_v17   ;;  %204 = vxpose.xlu0.b32.start [1/2] (short) (narrow) %v202_v15, 8 }
  0xca   :  { %289 = vrot.lane.b32.xlu2 %v203_v17, %s786_s0 }
  0xd1   :  { %746 = vset.pattern.permute.xlu1 %v787_v16  ;;  %205 = vxpose.xlu0.b32.end [2/2] (short) (narrow) %v203_v17, 8 }
  0xd2   :  { %518 = vrot.lane.b32.xlu2 %v203_v17, %s784_s2  ;;  %455 = vperm.xlu1 %746, %v203_v17  }
  0xda   :  { %747 = vset.pattern.permute.xlu1 %v788_v18 }
  0xdb   :  { %559 = vperm.xlu1 %747, %v203_v17  }
 0x101   :  { %v413_v19 = vpop.permute.xlu2 %412 }
 0x109   :  { %v855_v20 = vpop.permute.xlu2 %326 }
 0x110   :  { %418 = vxpose.xlu1.b32.start [1/2] (short) (narrow) %v413_v19, 8 }
 0x112   :  { %v857_v21 = vpop.permute.xlu2 %451 }
 0x119   :  { %v517_v27 = vpop.permute.xlu0 %516 }
 0x11a   :  { %v239_v22 = vpop.permute.xlu1 %238 }
 0x11b   :  { %v859_v23 = vpop.permute.xlu2 %555 }
 0x122   :  { %v288_v24 = vpop.permute.xlu1 %287 }
 0x123   :  { %293 = vxpose.xlu2.b32.start [1/2] (short) (narrow) %v288_v24, 8 }
 0x124   :  { %v290_v25 = vpop.permute.xlu2 %289 }
 0x12a   :  { %v415_v26 = vpop.permute.xlu1 %414 }
 0x12b   :  { %294 = vxpose.xlu2.b32.end [2/2] (short) (narrow) %v290_v25, 8  ;;  %419 = vxpose.xlu1.b32.end [2/2] (short) (narrow) %v415_v26, 8 }
 0x12c   :  { %v519_v28 = vpop.permute.xlu2 %518 }
 0x132   :  { %v331_v31 = vpop.permute.xlu1 %330 }
 0x133   :  { %522 = vxpose.xlu2.b32.start [1/2] (short) (narrow) %v517_v27, 8 }
 0x138   :  { %748 = vset.pattern.permute.xlu0 %v788_v18 }
 0x13b   :  { %523 = vxpose.xlu2.b32.end [2/2] (short) (narrow) %v519_v28, 8  ;;  %v244_v36 = vpop.permute.xlu1 %243 }
 0x144   :  { %v456_v56 = vpop.permute.xlu1 %455 }
 0x14d   :  { %v560_v59 = vpop.permute.xlu1 %559 }
 0x16d   :  { %v220_v33 = vpop.trf.xlu0 }
 0x16e   :  { %v246_v34 = vperm.slane %v220_v33, 0 }
 0x170   :  { %v247_v37 = vadd.f32 %v246_v34, %v239_v22  ;;  %v248_v38 = vadd.f32 %v246_v34, %v244_v36 }
 0x172   :  { %vm249_vm2 = vcmp.gt.f32.partialorder %v247_v37, 0.0  ;;  %v251_v40 = vmul.f32 0.2, %v247_v37  ;;  %v252_v43 = vmul.f32 0.2, %v248_v38  ;;  %vm250_vm4 = vcmp.gt.f32.partialorder %v248_v38, 0.0 }
 0x174   :  { %v253_v41 = vsel %vm249_vm2, %v247_v37, %v251_v40  ;;  %v254_v47 = vsel %vm250_vm4, %v248_v38, %v252_v43  ;;  %v101_v43 = vpop.f32.mrf.mxu0 }
 0x175   :  { %v876_v44 = vsel %vm870_vm1, %v253_v41, -1e+30  ;;  %v886_v48 = vsel %vm880_vm5, %v254_v47, -1e+30 }
 0x176   :  { %v258_v45 = vsel %vm257_vm3, %v876_v44, -inf  ;;  %v261_v49 = vsel %vm257_vm3, %v886_v48, -inf }
 0x177   :  { %259 = vmax.xlane.f32.xlu0 %v258_v45 }
 0x17c   :  { %v103_v52 = vpop.f32.mrf.mxu0 }
 0x17d   :  { %v107_v53 = vpack.c.bf16 %v103_v52, %v103_v52 }
 0x17f   :  { %262 = vmax.xlane.f32.xlu0 %v261_v49  ;;  %110 = vst.msk [vmem:[#allocation2 + $0x4] sm:$0xf] %vm108_vm12, %v107_v53 }
 0x1bc   :  { %v309_v57 = vpop.trf.xlu2 }
 0x1bd   :  { %v333_v58 = vperm.slane %v309_v57, 0 }
 0x1bf   :  { %v334_v60 = vadd.f32 %v333_v58, %v855_v20  ;;  %v335_v61 = vadd.f32 %v333_v58, %v331_v31 }
 0x1c1   :  { %vm336_vm6 = vcmp.gt.f32.partialorder %v334_v60, 0.0  ;;  %v338_v62 = vmul.f32 0.2, %v334_v60  ;;  %vm337_vm7 = vcmp.gt.f32.partialorder %v335_v61, 0.0  ;;  %v339_v63 = vmul.f32 0.2, %v335_v61 }
 0x1c3   :  { %v340_v0 = vsel %vm336_vm6, %v334_v60, %v338_v62  ;;  %v341_v1 = vsel %vm337_vm7, %v335_v61, %v339_v63 }
 0x1c4   :  { %v342_v2 = vsel %vm870_vm1, %v340_v0, -1e+30  ;;  %v343_v3 = vsel %vm880_vm5, %v341_v1, -1e+30 }
 0x1c5   :  { %v344_v4 = vsel %vm257_vm3, %v342_v2, -inf  ;;  %v347_v5 = vsel %vm257_vm3, %v343_v3, -inf }
 0x1c6   :  { %345 = vmax.xlane.f32.xlu2 %v344_v4  ;;  %348 = vmax.xlane.f32.xlu1 %v347_v5 }
 0x1c7   :  { %v434_v6 = vpop.trf.xlu1 }
 0x1c8   :  { %v458_v7 = vperm.slane %v434_v6, 0 }
 0x1ca   :  { %v459_v8 = vadd.f32 %v458_v7, %v857_v21  ;;  %v460_v9 = vadd.f32 %v458_v7, %v456_v56 }
 0x1cc   :  { %v538_v10 = vpop.trf.xlu2  ;;  %vm461_vm8 = vcmp.gt.f32.partialorder %v459_v8, 0.0  ;;  %v463_v11 = vmul.f32 0.2, %v459_v8  ;;  %v464_v14 = vmul.f32 0.2, %v460_v9  ;;  %vm462_vm9 = vcmp.gt.f32.partialorder %v460_v9, 0.0 }
 0x1cd   :  { %v562_v12 = vperm.slane %v538_v10, 0 }
 0x1ce   :  { %v465_v13 = vsel %vm461_vm8, %v459_v8, %v463_v11  ;;  %v466_v18 = vsel %vm462_vm9, %v460_v9, %v464_v14 }
 0x1cf   :  { %v467_v15 = vsel %vm870_vm1, %v465_v13, -1e+30  ;;  %v563_v17 = vadd.f32 %v562_v12, %v859_v23  ;;  %v923_v19 = vsel %vm880_vm5, %v466_v18, -1e+30  ;;  %v564_v22 = vadd.f32 %v562_v12, %v560_v59 }
 0x1d0   :  { %v469_v16 = vsel %vm257_vm3, %v467_v15, -inf  ;;  %v472_v21 = vsel %vm257_vm3, %v923_v19, -inf }
 0x1d1   :  { %470 = vmax.xlane.f32.xlu0 %v469_v16  ;;  %v567_v20 = vmul.f32 0.2, %v563_v17  ;;  %vm565_vm10 = vcmp.gt.f32.partialorder %v563_v17, 0.0  ;;  %v568_v26 = vmul.f32 0.2, %v564_v22  ;;  %vm566_vm11 = vcmp.gt.f32.partialorder %v564_v22, 0.0 }
 0x1d3   :  { %v569_v24 = vsel %vm565_vm10, %v563_v17, %v567_v20  ;;  %v570_v27 = vsel %vm566_vm11, %v564_v22, %v568_v26 }
 0x1d4   :  { %v929_v25 = vsel %vm870_vm1, %v569_v24, -1e+30  ;;  %v935_v28 = vsel %vm880_vm5, %v570_v27, -1e+30 }
 0x1d5   :  { %v573_v23 = vsel %vm257_vm3, %v929_v25, -inf  ;;  %v576_v29 = vsel %vm257_vm3, %v935_v28, -inf }
 0x1d9   :  { %473 = vmax.xlane.f32.xlu0 %v472_v21 }
 0x1e1   :  { %574 = vmax.xlane.f32.xlu0 %v573_v23 }
 0x1e9   :  { %577 = vmax.xlane.f32.xlu0 %v576_v29 }
 0x1ea   :  { %v260_v30 = vpop.xlane.xlu0 %259 }
 0x1eb   :  { %v264_v31 = vsub.f32 %v876_v44, %v260_v30  ;;  %v106_v44 = vpack.c.bf16 %v101_v43, %v101_v43 }
 0x1ed   :  { %v266_v32 = vmul.f32 1.442695, %v264_v31  ;;  %109 = vst.msk [vmem:[#allocation2] sm:$0xf] %vm108_vm12, %v106_v44 }
 0x1ef   :  { %750 = vpow2.f32 %v266_v32 }
 0x1f2   :  { %v263_v33 = vpop.xlane.xlu0 %262 }
 0x1f3   :  { %v265_v34 = vsub.f32 %v886_v48, %v263_v33 }
 0x1f4   :  { %v724_v61 = vld [vmem:[#allocation2] sm:$0xff] }
 0x1f5   :  { %v751_v35 = vpop.eup %750  ;;  %v268_v36 = vmul.f32 1.442695, %v265_v34  ;;  %374 = vrot.lane.b32.xlu2 %v724_v61, %s789_s1  ;;  %405 = vmatpush.bf16.msra.mxu3 %v724_v61 }
 0x1f6   :  { %v943_v37 = vsel %vm870_vm1, %v751_v35, 0.0 }
 0x1f7   :  { %752 = vpow2.f32 %v268_v36  ;;  %v272_v38 = vsel %vm257_vm3, %v943_v37, 0.0 }
 0x1f8   :  { %273 = vadd.xlane.f32.xlu0 %v272_v38 }
 0x1fd   :  { %v753_v40 = vpop.eup %752 }
 0x1fe   :  { %v949_v41 = vsel %vm880_vm5, %v753_v40, 0.0 }
 0x1ff   :  { %v275_v42 = vsel %vm257_vm3, %v949_v41, 0.0 }
 0x200   :  { %276 = vadd.xlane.f32.xlu1 %v275_v42 }
 0x239   :  { %v346_v45 = vpop.xlane.xlu2 %345  ;;  %v349_v47 = vpop.xlane.xlu1 %348 }
 0x23a   :  { %v350_v48 = vsub.f32 %v342_v2, %v346_v45  ;;  %v351_v49 = vsub.f32 %v343_v3, %v349_v47 }
 0x23c   :  { %v352_v50 = vmul.f32 1.442695, %v350_v48  ;;  %v354_v51 = vmul.f32 1.442695, %v351_v49 }
 0x23e   :  { %754 = vpow2.f32 %v352_v50 }
 0x23f   :  { %756 = vpow2.f32 %v354_v51 }
 0x244   :  { %v755_v54 = vpop.eup %754  ;;  %v471_v55 = vpop.xlane.xlu0 %470 }
 0x245   :  { %v757_v56 = vpop.eup %756  ;;  %v475_v57 = vsub.f32 %v467_v15, %v471_v55  ;;  %v356_v58 = vsel %vm870_vm1, %v755_v54, 0.0 }
 0x246   :  { %v358_v59 = vsel %vm257_vm3, %v356_v58, 0.0  ;;  %v357_v60 = vsel %vm880_vm5, %v757_v56, 0.0 }
 0x247   :  { %v477_v62 = vmul.f32 1.442695, %v475_v57  ;;  %359 = vadd.xlane.f32.xlu0 %v358_v59  ;;  %v361_v63 = vsel %vm257_vm3, %v357_v60, 0.0 }
 0x248   :  { %362 = vadd.xlane.f32.xlu1 %v361_v63 }
 0x249   :  { %758 = vpow2.f32 %v477_v62 }
 0x24c   :  { %v474_v0 = vpop.xlane.xlu0 %473 }
 0x24d   :  { %v476_v1 = vsub.f32 %v923_v19, %v474_v0 }
 0x24f   :  { %v759_v2 = vpop.eup %758  ;;  %v479_v3 = vmul.f32 1.442695, %v476_v1  ;;  %v375_v46 = vpop.permute.xlu2 %374 }
 0x250   :  { %v481_v4 = vsel %vm870_vm1, %v759_v2, 0.0  ;;  %387 = vmatpush.bf16.msra.mxu2 %v375_v46 }
 0x251   :  { %760 = vpow2.f32 %v479_v3  ;;  %v483_v5 = vsel %vm257_vm3, %v481_v4, 0.0 }
 0x252   :  { %484 = vadd.xlane.f32.xlu0 %v483_v5 }
 0x254   :  { %v575_v6 = vpop.xlane.xlu0 %574 }
 0x255   :  { %v579_v7 = vsub.f32 %v929_v25, %v575_v6 }
 0x257   :  { %v761_v8 = vpop.eup %760  ;;  %v581_v9 = vmul.f32 1.442695, %v579_v7 }
 0x258   :  { %v482_v10 = vsel %vm880_vm5, %v761_v8, 0.0 }
 0x259   :  { %762 = vpow2.f32 %v581_v9  ;;  %v486_v11 = vsel %vm257_vm3, %v482_v10, 0.0 }
 0x25a   :  { %487 = vadd.xlane.f32.xlu1 %v486_v11 }
 0x25c   :  { %v578_v12 = vpop.xlane.xlu0 %577 }
 0x25d   :  { %v580_v13 = vsub.f32 %v935_v28, %v578_v12 }
 0x25f   :  { %v763_v14 = vpop.eup %762  ;;  %v583_v15 = vmul.f32 1.442695, %v580_v13 }
 0x260   :  { %v585_v16 = vsel %vm870_vm1, %v763_v14, 0.0 }
 0x261   :  { %764 = vpow2.f32 %v583_v15  ;;  %v587_v17 = vsel %vm257_vm3, %v585_v16, 0.0 }
 0x262   :  { %588 = vadd.xlane.f32.xlu0 %v587_v17 }
 0x267   :  { %v765_v18 = vpop.eup %764 }
 0x268   :  { %v586_v19 = vsel %vm880_vm5, %v765_v18, 0.0 }
 0x269   :  { %v590_v20 = vsel %vm257_vm3, %v586_v19, 0.0 }
 0x26a   :  { %591 = vadd.xlane.f32.xlu1 %v590_v20 }
 0x26b   :  { %v274_v21 = vpop.xlane.xlu0 %273 }
 0x26c   :  { %766 = vrcp.f32 %v274_v21 }
 0x272   :  { %v767_v24 = vpop.eup %766 }
 0x273   :  { %v277_v22 = vpop.xlane.xlu1 %276  ;;  %v280_v25 = vmul.f32 %v767_v24, %v943_v37 }
 0x274   :  { %768 = vrcp.f32 %v277_v22 }
 0x276   :  { %494 = vrot.lane.b32.xlu0 %v724_v61, %s790_s6 }
 0x27a   :  { %v769_v39 = vpop.eup %768 }
 0x27b   :  { %v281_v26 = vmul.f32 %v769_v39, %v949_v41 }
 0x27d   :  { %v282_v23 = vpack.c.bf16 %v281_v26, %v280_v25 }
 0x27f   :  { %705 = vmatmul.msk.bf16.vlgmr.msra.gmra.mxu3 %vm257_vm3, %v282_v23 }
 0x283   :  { %598 = vrot.lane.b32.xlu1 %v724_v61, %s791_s7  ;;  %v749_v61 = vld [vmem:[%s995_s4] ss:$0 sm:$0xff] }
 0x2ba   :  { %v360_v27 = vpop.xlane.xlu0 %359 }
 0x2bb   :  { %770 = vrcp.f32 %v360_v27  ;;  %v363_v28 = vpop.xlane.xlu1 %362 }
 0x2bc   :  { %772 = vrcp.f32 %v363_v28 }
 0x2c1   :  { %v771_v29 = vpop.eup %770 }
 0x2c2   :  { %v773_v30 = vpop.eup %772  ;;  %v366_v31 = vmul.f32 %v771_v29, %v356_v58 }
 0x2c3   :  { %v367_v32 = vmul.f32 %v773_v30, %v357_v60 }
 0x2c5   :  { %v368_v33 = vpack.c.bf16 %v367_v32, %v366_v31  ;;  %v485_v34 = vpop.xlane.xlu0 %484 }
 0x2c7   :  { %704 = vmatmul.msk.bf16.vlgmr.msra.gmra.mxu2 %vm257_vm3, %v368_v33 }
 0x2cd   :  { %v488_v35 = vpop.xlane.xlu1 %487 }
 0x2ce   :  { %774 = vrcp.f32 %v488_v35 }
 0x2cf   :  { %776 = vrcp.f32 %v485_v34 }
 0x2d4   :  { %v775_v37 = vpop.eup %774 }
 0x2d5   :  { %v589_v36 = vpop.xlane.xlu0 %588  ;;  %v777_v38 = vpop.eup %776  ;;  %v492_v40 = vmul.f32 %v775_v37, %v482_v10 }
 0x2d6   :  { %v491_v42 = vmul.f32 %v777_v38, %v481_v4 }
 0x2d8   :  { %v493_v44 = vpack.c.bf16 %v492_v40, %v491_v42 }
 0x2dd   :  { %v592_v41 = vpop.xlane.xlu1 %591 }
 0x2de   :  { %778 = vrcp.f32 %v592_v41 }
 0x2df   :  { %780 = vrcp.f32 %v589_v36 }
 0x2e4   :  { %v779_v45 = vpop.eup %778 }
 0x2e5   :  { %v781_v47 = vpop.eup %780  ;;  %v596_v48 = vmul.f32 %v779_v45, %v586_v19 }
 0x2e6   :  { %v595_v49 = vmul.f32 %v781_v47, %v585_v16 }
 0x2e8   :  { %v495_v43 = vpop.permute.xlu0 %494  ;;  %v597_v51 = vpack.c.bf16 %v596_v48, %v595_v49 }
 0x2e9   :  { %507 = vmatpush.bf16.msrb.mxu2 %v495_v43 }
 0x2ec   :  { %706 = vmatmul.msk.bf16.vlgmr.msrb.gmra.mxu2 %vm257_vm3, %v493_v44 }
 0x2f5   :  { %v599_v50 = vpop.permute.xlu1 %598 }
 0x2f6   :  { %611 = vmatpush.bf16.msrb.mxu3 %v599_v50 }
 0x2f9   :  { %707 = vmatmul.msk.bf16.vlgmr.msrb.gmra.mxu3 %vm257_vm3, %v597_v51 }
 0x302   :  { %v407_v53 = vpop.f32.mrf.mxu3 }
 0x30a   :  { %v409_v55 = vpop.f32.mrf.mxu3 }
 0x34a   :  { %v389_v52 = vpop.f32.mrf.mxu2 }
 0x34b   :  { %v408_v57 = vadd.f32 %v407_v53, %v389_v52 }
 0x352   :  { %v391_v54 = vpop.f32.mrf.mxu2 }
 0x353   :  { %v410_v0 = vadd.f32 %v409_v55, %v391_v54 }
 0x36f   :  { %v509_v56 = vpop.f32.mrf.mxu2 }
 0x370   :  { %v514_v58 = vadd.f32 %v509_v56, %v408_v57 }
 0x377   :  { %v511_v63 = vpop.f32.mrf.mxu2 }
 0x378   :  { %v515_v3 = vadd.f32 %v511_v63, %v410_v0 }
 0x37c   :  { %v613_v59 = vpop.f32.mrf.mxu3 }
 0x37d   :  { %v618_v60 = vadd.f32 %v613_v59, %v514_v58 }
 0x37f   :  { %v620_v62 = vmul.f32 0.25, %v618_v60 }
 0x381   :  { %v622_v1 = vsel %vm257_vm3, %v620_v62, 0.0 }
 0x382   :  { %v628_v2 = vadd.f32 %v749_v61, %v622_v1 }
 0x384   :  { %630 = vst [vmem:[%s996_s5] sm:$0xff] %v628_v2  ;;  %v615_v4 = vpop.f32.mrf.mxu3 }
 0x385   :  { %v619_v5 = vadd.f32 %v615_v4, %v515_v3 }
 0x387   :  { %v621_v6 = vmul.f32 0.25, %v619_v5 }
 0x389   :  { %v623_v7 = vsel %vm257_vm3, %v621_v6, 0.0 }
 0x38a   :  { %v629_v8 = vadd.f32 %v749_v61, %v623_v7 }
 0x38c   :  { %631 = vst [vmem:[%s996_s5 + $0x8] sm:$0xff] %v629_v8 }

// kernel: dcgat_encoder.5
= control target key start
LH: loop header
LB: loop body
LE: loop exit
PB: predicated region body
PF: predicated region fallthrough
CT: control target
= control target key end

     0   :  { %v783_v11 = vmov 4   ;;  %v784_v12 = vmov 5   ;;  %vm189_vm0 = vcmask 64512   ;;  %s787_s13 = smov 127   ;;  %v788_v16 = vmov 6   ;;  %s791_s6 = smov 112   ;;  %s994_s2 = inlined_call_operand.vmem [shape: bf16[128,8], index: 2, kind: input, shape index: {}]   ;;  %s995_s0 = inlined_call_operand.vmem [shape: f32[16,128], index: 0, kind: input, shape index: {}]   ;;  %s996_s1 = inlined_call_operand.vmem [shape: bf16[128,32], index: 1, kind: input, shape index: {}]   ;;  %s997_s3 = inlined_call_operand.vmem [shape: bf16[16,16], index: 3, kind: input, shape index: {}]   ;;  %s998_s4 = inlined_call_operand.vmem [shape: f32[1,128], index: 4, kind: input, shape index: {}]   ;;  %s999_s5 = inlined_call_operand.vmem [shape: f32[16,128], index: 5, kind: output, shape index: {}]  }
   0x1   :  { %v724_v0 = vld [vmem:[%s994_s2 + $0x38] sm:$0xff]  ;;  %v723_v1 = vld [vmem:[%s994_s2 + $0x30] sm:$0xff]  ;;  %v722_v2 = vld [vmem:[%s994_s2 + $0x28] sm:$0xff]  ;;  %741 = vset.pattern.permute.xlu1 %v783_v11  ;;  %742 = vset.pattern.permute.xlu2 %v784_v12  ;;  %v789_v18 = vmov 7   ;;  %vm257_vm3 = vcmask 130048   ;;  %vm108_vm12 = vcmask 257024  }
   0x2   :  { %175 = vmatpush.bf16.msra.mxu1 %v724_v0  ;;  %v721_v3 = vld [vmem:[%s994_s2 + $0x20] sm:$0xff]  ;;  %v720_v4 = vld [vmem:[%s994_s2 + $0x18] sm:$0xff]  ;;  %v719_v5 = vld [vmem:[%s994_s2 + $0x10] sm:$0xff]  ;;  %s792_s7 = smov 104  }
   0x3   :  { %v718_v6 = vld [vmem:[%s994_s2 + $0x8] sm:$0xff]  ;;  %v717_v7 = vld [vmem:[%s994_s2] sm:$0xff]  ;;  %s785_s2 = smov 125   ;;  %v716_v29 = vld [vmem:[%s996_s1 + $0x38] sm:$0xff] }
   0x4   :  { %v25_v8 = vld [vmem:[%s995_s0] sm:$0xff]  ;;  %v26_v9 = vld [vmem:[%s995_s0 + $0x8] sm:$0xff]  ;;  %s786_s0 = smov 126   ;;  %92 = vmatpush.bf16.msra.mxu0 %v716_v29  ;;  %v715_v30 = vld [vmem:[%s996_s1 + $0x30] sm:$0xff] }
   0x5   :  { %v853_v10 = vpack.c.bf16 %v26_v9, %v25_v8  ;;  %v727_v32 = vld [vmem:[%s997_s3] sm:$0xff]   ;;  %v714_v50 = vld [vmem:[%s996_s1 + $0x28] sm:$0xff]  ;;  %v712_v52 = vld [vmem:[%s996_s1 + $0x18] sm:$0xff] }
   0x6   :  { %176 = vmatpush.bf16.msra.mxu1 %v723_v1  ;;  %v728_v35 = vunpack.c.l.bf16 %v727_v32  ;;  %v729_v42 = vunpack.c.h.bf16 %v727_v32  ;;  %v713_v51 = vld [vmem:[%s996_s1 + $0x20] sm:$0xff]  ;;  %v711_v53 = vld [vmem:[%s996_s1 + $0x10] sm:$0xff]  ;;  %v710_v54 = vld [vmem:[%s996_s1 + $0x8] sm:$0xff] }
   0x7   :  { %v709_v55 = vld [vmem:[%s996_s1] sm:$0xff]  ;;  %s790_s1 = smov 120  }
   0x8   :  { %93 = vmatpush.bf16.msra.mxu0 %v715_v30  ;;  %vm873_vm1 = vcmp.gt.f32.partialorder %v728_v35, 0.0  ;;  %vm883_vm5 = vcmp.gt.f32.partialorder %v729_v42, 0.0 }
   0xa   :  { %177 = vmatpush.bf16.msra.mxu1 %v722_v2 }
   0xc   :  { %94 = vmatpush.bf16.msra.mxu0 %v714_v50 }
   0xe   :  { %178 = vmatpush.bf16.msra.mxu1 %v721_v3 }
  0x10   :  { %95 = vmatpush.bf16.msra.mxu0 %v713_v51 }
  0x12   :  { %179 = vmatpush.bf16.msra.mxu1 %v720_v4 }
  0x14   :  { %96 = vmatpush.bf16.msra.mxu0 %v712_v52 }
  0x16   :  { %180 = vmatpush.bf16.msra.mxu1 %v719_v5 }
  0x18   :  { %97 = vmatpush.bf16.msra.mxu0 %v711_v53 }
  0x1a   :  { %181 = vmatpush.bf16.msra.mxu1 %v718_v6 }
  0x1c   :  { %98 = vmatpush.bf16.msra.mxu0 %v710_v54 }
  0x1e   :  { %182 = vmatpush.bf16.msra.mxu1 %v717_v7 }
  0x20   :  { %99 = vmatpush.bf16.msra.mxu0 %v709_v55 }
  0x21   :  { %183 = vmatmul.bf16.vlgmr.msra.gmra.mxu1 %v853_v10 }
  0x23   :  { %100 = vmatmul.bf16.vlgmr.msra.gmra.mxu0 %v853_v10 }
  0x9e   :  { %v184_v13 = vpop.f32.mrf.mxu1 }
  0x9f   :  { %190 = vst.msk [vmem:[#allocation3] sm:$0xff] %vm189_vm0, %v184_v13 }
  0xa6   :  { %v186_v14 = vpop.f32.mrf.mxu1  ;;  %v202_v15 = vld [vmem:[#allocation3] sm:$0xff] }
  0xa7   :  { %191 = vst.msk [vmem:[#allocation3 + $0x8] sm:$0xff] %vm189_vm0, %v186_v14  ;;  %516 = vrot.lane.b32.xlu0 %v202_v15, %s785_s2  ;;  %412 = vrot.lane.b32.xlu2 %v202_v15, %s786_s0 }
  0xa8   :  { %238 = vperm.xlu1 %741, %v202_v15  }
  0xae   :  { %v203_v17 = vld [vmem:[#allocation3 + $0x8] sm:$0xff] }
  0xaf   :  { %326 = vperm.xlu2 %742, %v202_v15  }
  0xb0   :  { %287 = vrot.lane.b32.xlu1 %v202_v15, %s787_s13 }
  0xb1   :  { %745 = vset.pattern.permute.xlu1 %v784_v12 }
  0xb7   :  { %743 = vset.pattern.permute.xlu2 %v788_v16 }
  0xb8   :  { %414 = vrot.lane.b32.xlu1 %v203_v17, %s786_s0  ;;  %451 = vperm.xlu2 %743, %v202_v15  }
  0xc0   :  { %330 = vperm.xlu1 %745, %v203_v17   ;;  %744 = vset.pattern.permute.xlu2 %v789_v18 }
  0xc1   :  { %555 = vperm.xlu2 %744, %v202_v15  }
  0xc8   :  { %746 = vset.pattern.permute.xlu1 %v783_v11 }
  0xc9   :  { %243 = vperm.xlu1 %746, %v203_v17   ;;  %204 = vxpose.xlu0.b32.start [1/2] (short) (narrow) %v202_v15, 8 }
  0xca   :  { %289 = vrot.lane.b32.xlu2 %v203_v17, %s787_s13 }
  0xd1   :  { %747 = vset.pattern.permute.xlu1 %v788_v16  ;;  %205 = vxpose.xlu0.b32.end [2/2] (short) (narrow) %v203_v17, 8 }
  0xd2   :  { %518 = vrot.lane.b32.xlu2 %v203_v17, %s785_s2  ;;  %455 = vperm.xlu1 %747, %v203_v17  }
  0xda   :  { %748 = vset.pattern.permute.xlu1 %v789_v18 }
  0xdb   :  { %559 = vperm.xlu1 %748, %v203_v17  }
 0x101   :  { %v413_v19 = vpop.permute.xlu2 %412 }
 0x109   :  { %v858_v20 = vpop.permute.xlu2 %326 }
 0x110   :  { %418 = vxpose.xlu1.b32.start [1/2] (short) (narrow) %v413_v19, 8 }
 0x112   :  { %v860_v21 = vpop.permute.xlu2 %451 }
 0x119   :  { %v517_v27 = vpop.permute.xlu0 %516 }
 0x11a   :  { %v239_v22 = vpop.permute.xlu1 %238 }
 0x11b   :  { %v862_v23 = vpop.permute.xlu2 %555 }
 0x122   :  { %v288_v24 = vpop.permute.xlu1 %287 }
 0x123   :  { %293 = vxpose.xlu2.b32.start [1/2] (short) (narrow) %v288_v24, 8 }
 0x124   :  { %v290_v25 = vpop.permute.xlu2 %289 }
 0x12a   :  { %v415_v26 = vpop.permute.xlu1 %414 }
 0x12b   :  { %294 = vxpose.xlu2.b32.end [2/2] (short) (narrow) %v290_v25, 8  ;;  %419 = vxpose.xlu1.b32.end [2/2] (short) (narrow) %v415_v26, 8 }
 0x12c   :  { %v519_v28 = vpop.permute.xlu2 %518 }
 0x132   :  { %v331_v31 = vpop.permute.xlu1 %330 }
 0x133   :  { %522 = vxpose.xlu2.b32.start [1/2] (short) (narrow) %v517_v27, 8 }
 0x138   :  { %749 = vset.pattern.permute.xlu0 %v789_v18 }
 0x13b   :  { %523 = vxpose.xlu2.b32.end [2/2] (short) (narrow) %v519_v28, 8  ;;  %v244_v36 = vpop.permute.xlu1 %243 }
 0x144   :  { %v456_v56 = vpop.permute.xlu1 %455 }
 0x14d   :  { %v560_v59 = vpop.permute.xlu1 %559 }
 0x16d   :  { %v220_v33 = vpop.trf.xlu0 }
 0x16e   :  { %v246_v34 = vperm.slane %v220_v33, 0 }
 0x170   :  { %v247_v37 = vadd.f32 %v246_v34, %v239_v22  ;;  %v248_v38 = vadd.f32 %v246_v34, %v244_v36 }
 0x172   :  { %vm249_vm2 = vcmp.gt.f32.partialorder %v247_v37, 0.0  ;;  %v251_v40 = vmul.f32 0.2, %v247_v37  ;;  %v252_v43 = vmul.f32 0.2, %v248_v38  ;;  %vm250_vm4 = vcmp.gt.f32.partialorder %v248_v38, 0.0 }
 0x174   :  { %v253_v41 = vsel %vm249_vm2, %v247_v37, %v251_v40  ;;  %v254_v47 = vsel %vm250_vm4, %v248_v38, %v252_v43  ;;  %v101_v43 = vpop.f32.mrf.mxu0 }
 0x175   :  { %v879_v44 = vsel %vm873_vm1, %v253_v41, -1e+30  ;;  %v889_v48 = vsel %vm883_vm5, %v254_v47, -1e+30 }
 0x176   :  { %v258_v45 = vsel %vm257_vm3, %v879_v44, -inf  ;;  %v261_v49 = vsel %vm257_vm3, %v889_v48, -inf }
 0x177   :  { %259 = vmax.xlane.f32.xlu0 %v258_v45 }
 0x17c   :  { %v103_v52 = vpop.f32.mrf.mxu0 }
 0x17d   :  { %v107_v53 = vpack.c.bf16 %v103_v52, %v103_v52 }
 0x17f   :  { %262 = vmax.xlane.f32.xlu0 %v261_v49  ;;  %110 = vst.msk [vmem:[#allocation2 + $0x4] sm:$0xf] %vm108_vm12, %v107_v53 }
 0x1bc   :  { %v309_v57 = vpop.trf.xlu2 }
 0x1bd   :  { %v333_v58 = vperm.slane %v309_v57, 0 }
 0x1bf   :  { %v334_v60 = vadd.f32 %v333_v58, %v858_v20  ;;  %v335_v61 = vadd.f32 %v333_v58, %v331_v31 }
 0x1c1   :  { %vm336_vm6 = vcmp.gt.f32.partialorder %v334_v60, 0.0  ;;  %v338_v62 = vmul.f32 0.2, %v334_v60  ;;  %vm337_vm7 = vcmp.gt.f32.partialorder %v335_v61, 0.0  ;;  %v339_v63 = vmul.f32 0.2, %v335_v61 }
 0x1c3   :  { %v340_v0 = vsel %vm336_vm6, %v334_v60, %v338_v62  ;;  %v341_v1 = vsel %vm337_vm7, %v335_v61, %v339_v63 }
 0x1c4   :  { %v342_v2 = vsel %vm873_vm1, %v340_v0, -1e+30  ;;  %v343_v3 = vsel %vm883_vm5, %v341_v1, -1e+30 }
 0x1c5   :  { %v344_v4 = vsel %vm257_vm3, %v342_v2, -inf  ;;  %v347_v5 = vsel %vm257_vm3, %v343_v3, -inf }
 0x1c6   :  { %345 = vmax.xlane.f32.xlu2 %v344_v4  ;;  %348 = vmax.xlane.f32.xlu1 %v347_v5 }
 0x1c7   :  { %v434_v6 = vpop.trf.xlu1 }
 0x1c8   :  { %v458_v7 = vperm.slane %v434_v6, 0 }
 0x1ca   :  { %v459_v8 = vadd.f32 %v458_v7, %v860_v21  ;;  %v460_v9 = vadd.f32 %v458_v7, %v456_v56 }
 0x1cc   :  { %v538_v10 = vpop.trf.xlu2  ;;  %vm461_vm8 = vcmp.gt.f32.partialorder %v459_v8, 0.0  ;;  %v463_v11 = vmul.f32 0.2, %v459_v8  ;;  %v464_v14 = vmul.f32 0.2, %v460_v9  ;;  %vm462_vm9 = vcmp.gt.f32.partialorder %v460_v9, 0.0 }
 0x1cd   :  { %v562_v12 = vperm.slane %v538_v10, 0 }
 0x1ce   :  { %v465_v13 = vsel %vm461_vm8, %v459_v8, %v463_v11  ;;  %v466_v18 = vsel %vm462_vm9, %v460_v9, %v464_v14 }
 0x1cf   :  { %v467_v15 = vsel %vm873_vm1, %v465_v13, -1e+30  ;;  %v563_v17 = vadd.f32 %v562_v12, %v862_v23  ;;  %v926_v19 = vsel %vm883_vm5, %v466_v18, -1e+30  ;;  %v564_v22 = vadd.f32 %v562_v12, %v560_v59 }
 0x1d0   :  { %v469_v16 = vsel %vm257_vm3, %v467_v15, -inf  ;;  %v472_v21 = vsel %vm257_vm3, %v926_v19, -inf }
 0x1d1   :  { %470 = vmax.xlane.f32.xlu0 %v469_v16  ;;  %v567_v20 = vmul.f32 0.2, %v563_v17  ;;  %vm565_vm10 = vcmp.gt.f32.partialorder %v563_v17, 0.0  ;;  %v568_v26 = vmul.f32 0.2, %v564_v22  ;;  %vm566_vm11 = vcmp.gt.f32.partialorder %v564_v22, 0.0 }
 0x1d3   :  { %v569_v24 = vsel %vm565_vm10, %v563_v17, %v567_v20  ;;  %v570_v27 = vsel %vm566_vm11, %v564_v22, %v568_v26 }
 0x1d4   :  { %v932_v25 = vsel %vm873_vm1, %v569_v24, -1e+30  ;;  %v938_v28 = vsel %vm883_vm5, %v570_v27, -1e+30 }
 0x1d5   :  { %v573_v23 = vsel %vm257_vm3, %v932_v25, -inf  ;;  %v576_v29 = vsel %vm257_vm3, %v938_v28, -inf }
 0x1d9   :  { %473 = vmax.xlane.f32.xlu0 %v472_v21 }
 0x1e1   :  { %574 = vmax.xlane.f32.xlu0 %v573_v23 }
 0x1e9   :  { %577 = vmax.xlane.f32.xlu0 %v576_v29 }
 0x1ea   :  { %v260_v30 = vpop.xlane.xlu0 %259 }
 0x1eb   :  { %v264_v31 = vsub.f32 %v879_v44, %v260_v30  ;;  %v106_v44 = vpack.c.bf16 %v101_v43, %v101_v43 }
 0x1ed   :  { %v266_v32 = vmul.f32 1.442695, %v264_v31  ;;  %109 = vst.msk [vmem:[#allocation2] sm:$0xf] %vm108_vm12, %v106_v44 }
 0x1ef   :  { %751 = vpow2.f32 %v266_v32 }
 0x1f2   :  { %v263_v33 = vpop.xlane.xlu0 %262 }
 0x1f3   :  { %v265_v34 = vsub.f32 %v889_v48, %v263_v33 }
 0x1f4   :  { %v725_v61 = vld [vmem:[#allocation2] sm:$0xff] }
 0x1f5   :  { %v752_v35 = vpop.eup %751  ;;  %v268_v36 = vmul.f32 1.442695, %v265_v34  ;;  %374 = vrot.lane.b32.xlu2 %v725_v61, %s790_s1  ;;  %405 = vmatpush.bf16.msra.mxu3 %v725_v61 }
 0x1f6   :  { %v946_v37 = vsel %vm873_vm1, %v752_v35, 0.0 }
 0x1f7   :  { %753 = vpow2.f32 %v268_v36  ;;  %v272_v38 = vsel %vm257_vm3, %v946_v37, 0.0 }
 0x1f8   :  { %273 = vadd.xlane.f32.xlu0 %v272_v38 }
 0x1fd   :  { %v754_v40 = vpop.eup %753 }
 0x1fe   :  { %v952_v41 = vsel %vm883_vm5, %v754_v40, 0.0 }
 0x1ff   :  { %v275_v42 = vsel %vm257_vm3, %v952_v41, 0.0 }
 0x200   :  { %276 = vadd.xlane.f32.xlu1 %v275_v42 }
 0x239   :  { %v346_v45 = vpop.xlane.xlu2 %345  ;;  %v349_v47 = vpop.xlane.xlu1 %348 }
 0x23a   :  { %v350_v48 = vsub.f32 %v342_v2, %v346_v45  ;;  %v351_v49 = vsub.f32 %v343_v3, %v349_v47 }
 0x23c   :  { %v352_v50 = vmul.f32 1.442695, %v350_v48  ;;  %v354_v51 = vmul.f32 1.442695, %v351_v49 }
 0x23e   :  { %755 = vpow2.f32 %v352_v50 }
 0x23f   :  { %757 = vpow2.f32 %v354_v51 }
 0x244   :  { %v756_v54 = vpop.eup %755  ;;  %v471_v55 = vpop.xlane.xlu0 %470 }
 0x245   :  { %v758_v56 = vpop.eup %757  ;;  %v475_v57 = vsub.f32 %v467_v15, %v471_v55  ;;  %v356_v58 = vsel %vm873_vm1, %v756_v54, 0.0 }
 0x246   :  { %v358_v59 = vsel %vm257_vm3, %v356_v58, 0.0  ;;  %v357_v60 = vsel %vm883_vm5, %v758_v56, 0.0 }
 0x247   :  { %v477_v62 = vmul.f32 1.442695, %v475_v57  ;;  %359 = vadd.xlane.f32.xlu0 %v358_v59  ;;  %v361_v63 = vsel %vm257_vm3, %v357_v60, 0.0 }
 0x248   :  { %362 = vadd.xlane.f32.xlu1 %v361_v63 }
 0x249   :  { %759 = vpow2.f32 %v477_v62 }
 0x24c   :  { %v474_v0 = vpop.xlane.xlu0 %473 }
 0x24d   :  { %v476_v1 = vsub.f32 %v926_v19, %v474_v0 }
 0x24f   :  { %v760_v2 = vpop.eup %759  ;;  %v479_v3 = vmul.f32 1.442695, %v476_v1  ;;  %v375_v46 = vpop.permute.xlu2 %374 }
 0x250   :  { %v481_v4 = vsel %vm873_vm1, %v760_v2, 0.0  ;;  %387 = vmatpush.bf16.msra.mxu2 %v375_v46 }
 0x251   :  { %761 = vpow2.f32 %v479_v3  ;;  %v483_v5 = vsel %vm257_vm3, %v481_v4, 0.0 }
 0x252   :  { %484 = vadd.xlane.f32.xlu0 %v483_v5 }
 0x254   :  { %v575_v6 = vpop.xlane.xlu0 %574 }
 0x255   :  { %v579_v7 = vsub.f32 %v932_v25, %v575_v6 }
 0x257   :  { %v762_v8 = vpop.eup %761  ;;  %v581_v9 = vmul.f32 1.442695, %v579_v7 }
 0x258   :  { %v482_v10 = vsel %vm883_vm5, %v762_v8, 0.0 }
 0x259   :  { %763 = vpow2.f32 %v581_v9  ;;  %v486_v11 = vsel %vm257_vm3, %v482_v10, 0.0 }
 0x25a   :  { %487 = vadd.xlane.f32.xlu1 %v486_v11 }
 0x25c   :  { %v578_v12 = vpop.xlane.xlu0 %577 }
 0x25d   :  { %v580_v13 = vsub.f32 %v938_v28, %v578_v12 }
 0x25f   :  { %v764_v14 = vpop.eup %763  ;;  %v583_v15 = vmul.f32 1.442695, %v580_v13 }
 0x260   :  { %v585_v16 = vsel %vm873_vm1, %v764_v14, 0.0 }
 0x261   :  { %765 = vpow2.f32 %v583_v15  ;;  %v587_v17 = vsel %vm257_vm3, %v585_v16, 0.0 }
 0x262   :  { %588 = vadd.xlane.f32.xlu0 %v587_v17 }
 0x267   :  { %v766_v18 = vpop.eup %765 }
 0x268   :  { %v586_v19 = vsel %vm883_vm5, %v766_v18, 0.0 }
 0x269   :  { %v590_v20 = vsel %vm257_vm3, %v586_v19, 0.0 }
 0x26a   :  { %591 = vadd.xlane.f32.xlu1 %v590_v20 }
 0x26b   :  { %v274_v21 = vpop.xlane.xlu0 %273 }
 0x26c   :  { %767 = vrcp.f32 %v274_v21 }
 0x272   :  { %v768_v24 = vpop.eup %767 }
 0x273   :  { %v277_v22 = vpop.xlane.xlu1 %276  ;;  %v280_v25 = vmul.f32 %v768_v24, %v946_v37 }
 0x274   :  { %769 = vrcp.f32 %v277_v22 }
 0x276   :  { %494 = vrot.lane.b32.xlu0 %v725_v61, %s791_s6 }
 0x27a   :  { %v770_v39 = vpop.eup %769 }
 0x27b   :  { %v281_v26 = vmul.f32 %v770_v39, %v952_v41 }
 0x27d   :  { %v282_v23 = vpack.c.bf16 %v281_v26, %v280_v25 }
 0x27f   :  { %706 = vmatmul.msk.bf16.vlgmr.msra.gmra.mxu3 %vm257_vm3, %v282_v23 }
 0x283   :  { %598 = vrot.lane.b32.xlu1 %v725_v61, %s792_s7  ;;  %v750_v61 = vld [vmem:[%s998_s4] ss:$0 sm:$0xff] }
 0x2ba   :  { %v360_v27 = vpop.xlane.xlu0 %359 }
 0x2bb   :  { %771 = vrcp.f32 %v360_v27  ;;  %v363_v28 = vpop.xlane.xlu1 %362 }
 0x2bc   :  { %773 = vrcp.f32 %v363_v28 }
 0x2c1   :  { %v772_v29 = vpop.eup %771 }
 0x2c2   :  { %v774_v30 = vpop.eup %773  ;;  %v366_v31 = vmul.f32 %v772_v29, %v356_v58 }
 0x2c3   :  { %v367_v32 = vmul.f32 %v774_v30, %v357_v60 }
 0x2c5   :  { %v368_v33 = vpack.c.bf16 %v367_v32, %v366_v31  ;;  %v485_v34 = vpop.xlane.xlu0 %484 }
 0x2c7   :  { %705 = vmatmul.msk.bf16.vlgmr.msra.gmra.mxu2 %vm257_vm3, %v368_v33 }
 0x2cd   :  { %v488_v35 = vpop.xlane.xlu1 %487 }
 0x2ce   :  { %775 = vrcp.f32 %v488_v35 }
 0x2cf   :  { %777 = vrcp.f32 %v485_v34 }
 0x2d4   :  { %v776_v37 = vpop.eup %775 }
 0x2d5   :  { %v589_v36 = vpop.xlane.xlu0 %588  ;;  %v778_v38 = vpop.eup %777  ;;  %v492_v40 = vmul.f32 %v776_v37, %v482_v10 }
 0x2d6   :  { %v491_v42 = vmul.f32 %v778_v38, %v481_v4 }
 0x2d8   :  { %v493_v44 = vpack.c.bf16 %v492_v40, %v491_v42 }
 0x2dd   :  { %v592_v41 = vpop.xlane.xlu1 %591 }
 0x2de   :  { %779 = vrcp.f32 %v592_v41 }
 0x2df   :  { %781 = vrcp.f32 %v589_v36 }
 0x2e4   :  { %v780_v45 = vpop.eup %779 }
 0x2e5   :  { %v782_v47 = vpop.eup %781  ;;  %v596_v48 = vmul.f32 %v780_v45, %v586_v19 }
 0x2e6   :  { %v595_v49 = vmul.f32 %v782_v47, %v585_v16 }
 0x2e8   :  { %v495_v43 = vpop.permute.xlu0 %494  ;;  %v597_v51 = vpack.c.bf16 %v596_v48, %v595_v49 }
 0x2e9   :  { %507 = vmatpush.bf16.msrb.mxu2 %v495_v43 }
 0x2ec   :  { %707 = vmatmul.msk.bf16.vlgmr.msrb.gmra.mxu2 %vm257_vm3, %v493_v44 }
 0x2f5   :  { %v599_v50 = vpop.permute.xlu1 %598 }
 0x2f6   :  { %611 = vmatpush.bf16.msrb.mxu3 %v599_v50 }
 0x2f9   :  { %708 = vmatmul.msk.bf16.vlgmr.msrb.gmra.mxu3 %vm257_vm3, %v597_v51 }
 0x302   :  { %v407_v53 = vpop.f32.mrf.mxu3 }
 0x30a   :  { %v409_v55 = vpop.f32.mrf.mxu3 }
 0x34a   :  { %v389_v52 = vpop.f32.mrf.mxu2 }
 0x34b   :  { %v408_v57 = vadd.f32 %v407_v53, %v389_v52 }
 0x352   :  { %v391_v54 = vpop.f32.mrf.mxu2 }
 0x353   :  { %v410_v0 = vadd.f32 %v409_v55, %v391_v54 }
 0x36f   :  { %v509_v56 = vpop.f32.mrf.mxu2 }
 0x370   :  { %v514_v58 = vadd.f32 %v509_v56, %v408_v57 }
 0x377   :  { %v511_v63 = vpop.f32.mrf.mxu2 }
 0x378   :  { %v515_v3 = vadd.f32 %v511_v63, %v410_v0 }
 0x37c   :  { %v613_v59 = vpop.f32.mrf.mxu3 }
 0x37d   :  { %v618_v60 = vadd.f32 %v613_v59, %v514_v58 }
 0x37f   :  { %v620_v62 = vmul.f32 0.25, %v618_v60 }
 0x381   :  { %v623_v1 = vsel %vm189_vm0, %v620_v62, 0.0 }
 0x382   :  { %v629_v2 = vadd.f32 %v750_v61, %v623_v1 }
 0x384   :  { %631 = vst [vmem:[%s999_s5] sm:$0xff] %v629_v2  ;;  %v615_v4 = vpop.f32.mrf.mxu3 }
 0x385   :  { %v619_v5 = vadd.f32 %v615_v4, %v515_v3 }
 0x387   :  { %v621_v6 = vmul.f32 0.25, %v619_v5 }
 0x389   :  { %v624_v7 = vsel %vm189_vm0, %v621_v6, 0.0 }
 0x38a   :  { %v630_v8 = vadd.f32 %v750_v61, %v624_v7 }
 0x38c   :  { %632 = vst [vmem:[%s999_s5 + $0x8] sm:$0xff] %v630_v8 }

</bundles_post_ra>
